<compile_context>
chip_gen: v5e
topology: v5e:2x2
jax: 0.10.0
libtpu: 0.0.40
codegen_flags: <defaults>
</compile_context>

<pallas_src>
import functools

import jax
import jax.numpy as jnp
import numpy as np
from jax.experimental import pallas as pl
from jax.experimental.pallas import tpu as pltpu


def _round_up(x, m):
    return (x + m - 1) // m * m


def _conv_out(size, k, s):
    return (size - k) // s + 1


# ------------------------------- planning ---------------------------------- #
def build_plan(in_channels, hidden_size_list, kernel_size, stride, height, width):
    """Static per-layer metadata for the fused kernel."""
    plan = []
    cin, ih, iw = in_channels, height, width
    for i, (k, s) in enumerate(zip(kernel_size, stride)):
        cout = hidden_size_list[i]
        oh, ow = _conv_out(ih, k, s), _conv_out(iw, k, s)
        n_pos = oh * ow
        plan.append(dict(
            cin=cin, cout=cout, k=k, s=s, ih=ih, iw=iw, oh=oh, ow=ow,
            n_pos=n_pos, n_taps=k * k,
            pos_pad=_round_up(n_pos, 16),       # bf16 sublane tile (16 rows)
            relu=(i < len(kernel_size) - 1),    # layers[:-1] drops last ReLU
        ))
        cin, ih, iw = cout, oh, ow
    return plan


# ----------------------------- param prep ----------------------------------- #
def init_params(key, in_channels, hidden_size_list, kernel_size):
    """Deterministic PyTorch-style (uniform +-1/sqrt(fan_in)) conv params,
    torch layout: w (Cout, Cin, kh, kw), b (Cout,)."""
    params = []
    cin = in_channels
    for i, k in enumerate(kernel_size):
        cout = hidden_size_list[i]
        key, k1, k2 = jax.random.split(key, 3)
        bound = 1.0 / float(np.sqrt(cin * k * k))
        w = jax.random.uniform(k1, (cout, cin, k, k), jnp.float32, -bound, bound)
        b = jax.random.uniform(k2, (cout,), jnp.float32, -bound, bound)
        params.append((w, b))
        cin = cout
    return params


def _batched_gather_matrix(lp_prev, lp, tb, dtype):
    """Batch-folded block-diagonal 0/1 selection matrix G such that
       (G @ act)[t*(tb*pp) + b*pp + p, :] == act[b*prev_pp + src(t, p), :]
    where act rows are laid out (batch-within-block, padded position) and
    src(t, p) is the input pixel feeding kernel tap t of output position p.
    Rows for padded positions (p >= n_pos) and columns for padded previous
    positions are all-zero, keeping every slice 16-row aligned."""
    k, s, iw = lp["k"], lp["s"], lp["iw"]
    oh, ow = lp["oh"], lp["ow"]
    pp, prev_pp = lp["pos_pad"], lp_prev["pos_pad"]
    g = np.zeros((lp["n_taps"] * tb * pp, tb * prev_pp), dtype=np.float32)
    for kh in range(k):
        for kw in range(k):
            t = kh * k + kw
            for b in range(tb):
                for ph in range(oh):
                    for pw in range(ow):
                        p = ph * ow + pw
                        src = (ph * s + kh) * iw + (pw * s + kw)
                        g[t * tb * pp + b * pp + p, b * prev_pp + src] = 1.0
    return jnp.asarray(g, dtype=dtype)


def prepare_params(params, plan, tb, compute_dtype=jnp.bfloat16):
    """One-time (hoisted) re-layout of conv params into kernel operands."""
    ops = []
    for i, ((w, b), lp) in enumerate(zip(params, plan)):
        k, cin, cout = lp["k"], lp["cin"], lp["cout"]
        # torch (Cout, Cin, kh, kw) -> (kh, kw, Cin, Cout) -> (k*k*Cin, Cout)
        w_mat = jnp.transpose(w, (2, 3, 1, 0)).reshape(k * k * cin, cout)
        layer = dict(w=w_mat.astype(compute_dtype),
                     b=b.reshape(1, cout).astype(jnp.float32))
        if i > 0:
            layer["sel"] = _batched_gather_matrix(plan[i - 1], lp, tb, compute_dtype)
        ops.append(layer)
    return ops


# ------------------------------ fused kernel -------------------------------- #
def _conv_via_sel(act, sel, w, b, lp, tb, compute_dtype):
    """One conv layer on a batch-folded VMEM-resident activation:
    one MXU gather dot (block-diagonal 0/1 sel) + n_taps batch-folded tap dots."""
    n_taps, cin = lp["n_taps"], lp["cin"]
    m = tb * lp["pos_pad"]                       # batch-folded rows per tap
    # Exact gather (each row copies exactly one act row) -> single cast to bf16.
    g = jnp.dot(sel, act, preferred_element_type=jnp.float32).astype(compute_dtype)
    acc = jnp.dot(g[0:m, :], w[0:cin, :], preferred_element_type=jnp.float32)
    for t in range(1, n_taps):                   # static unroll (<= 16 fat dots)
        acc = acc + jnp.dot(g[t * m:(t + 1) * m, :], w[t * cin:(t + 1) * cin, :],
                            preferred_element_type=jnp.float32)
    acc = acc + b                                # padded rows: 0 + bias, never read
    if lp["relu"]:
        acc = jnp.maximum(acc, 0.0)
    return acc                                   # f32


def _fused_conv_kernel(*refs, plan, tb, compute_dtype):
    """One batch block (TB folded into rows): full conv stack, VMEM intermediates.
    refs = patches, w0, b0, (sel1, w1, b1), (sel2, w2, b2), ..., out."""
    o_ref = refs[-1]
    # Layer 1: batch-folded im2col patches, one fat matmul (M = TB * pos_pad_1).
    a = jnp.dot(refs[0][...], refs[1][...], preferred_element_type=jnp.float32)
    a = a + refs[2][...]
    if plan[0]["relu"]:
        a = jnp.maximum(a, 0.0)
    idx = 3
    for li in range(1, len(plan)):
        a = a.astype(compute_dtype)              # stays in VMEM/vregs (a value)
        sel, w, b = refs[idx][...], refs[idx + 1][...], refs[idx + 2][...]
        idx += 3
        a = _conv_via_sel(a, sel, w, b, plan[li], tb, compute_dtype)
    o_ref[...] = a.astype(o_ref.dtype)


def _fused_pallas_call(plan, ops, num_blocks, tb, compute_dtype, out_dtype=jnp.float32):
    l0, ll = plan[0], plan[-1]
    k1_cols = l0["n_taps"] * l0["cin"]
    m0 = tb * l0["pos_pad"]                      # batch-folded layer-1 rows
    m_out = tb * ll["pos_pad"]                   # batch-folded output rows

    in_specs = [pl.BlockSpec((m0, k1_cols), lambda bb: (bb, 0))]
    flops_per_blk = 2 * m0 * k1_cols * l0["cout"]
    for i, layer in enumerate(ops):
        if i > 0:
            sel = layer["sel"]
            in_specs.append(pl.BlockSpec(tuple(sel.shape), lambda bb: (0, 0)))
            flops_per_blk += 2 * sel.shape[0] * sel.shape[1] * plan[i]["cin"]
            flops_per_blk += (2 * plan[i]["n_taps"] * tb * plan[i]["pos_pad"]
                              * plan[i]["cin"] * plan[i]["cout"])
        in_specs.append(pl.BlockSpec(tuple(layer["w"].shape), lambda bb: (0, 0)))
        in_specs.append(pl.BlockSpec(tuple(layer["b"].shape), lambda bb: (0, 0)))
    out_specs = pl.BlockSpec((m_out, ll["cout"]), lambda bb: (bb, 0))
    out_shape = jax.ShapeDtypeStruct((num_blocks * m_out, ll["cout"]), out_dtype)

    # Advisory cost hint so XLA schedules the wrapper glue around the call well.
    bytes_in = num_blocks * m0 * k1_cols * np.dtype(compute_dtype).itemsize
    bytes_params = sum(int(np.prod(v.shape)) * v.dtype.itemsize
                       for layer in ops for v in layer.values())
    bytes_out = num_blocks * m_out * ll["cout"] * np.dtype(out_dtype).itemsize
    cost = pl.CostEstimate(flops=int(num_blocks * flops_per_blk), transcendentals=0,
                           bytes_accessed=int(bytes_in + bytes_params + bytes_out))

    kernel = functools.partial(_fused_conv_kernel, plan=plan, tb=tb,
                               compute_dtype=compute_dtype)
    return pl.pallas_call(
        kernel,
        out_shape=out_shape,
        grid=(num_blocks,),
        in_specs=in_specs,
        out_specs=out_specs,
        compiler_params=pltpu.CompilerParams(dimension_semantics=("parallel",)),
        cost_estimate=cost,
    )


# ------------------------------- JAX glue ----------------------------------- #
def _im2col_layer1(x_nhwc, k, s, pos_pad):
    """(B,H,W,C) -> (B, pos_pad, k*k*C) valid-conv patches, (kh,kw,ci) minor order,
    zero-padded from OH*OW to pos_pad rows (sublane alignment)."""
    B, H, W, C = x_nhwc.shape
    OH, OW = _conv_out(H, k, s), _conv_out(W, k, s)
    cols = []
    for kh in range(k):
        for kw in range(k):
            cols.append(x_nhwc[:, kh:kh + s * OH:s, kw:kw + s * OW:s, :])
    p = jnp.stack(cols, axis=3)                       # (B, OH, OW, k*k, C)
    p = p.reshape(B, OH * OW, k * k * C)
    pad = pos_pad - OH * OW
    if pad:
        p = jnp.pad(p, ((0, 0), (0, pad), (0, 0)))
    return p


def make_forward(plan, ops, tb, compute_dtype=jnp.bfloat16):
    """Returns a jitted NCHW->NCHW forward equivalent to BFSConvEncoder.forward."""
    l0, ll = plan[0], plan[-1]
    flat_ops = []
    for i, layer in enumerate(ops):
        if i > 0:
            flat_ops.append(layer["sel"])
        flat_ops.append(layer["w"])
        flat_ops.append(layer["b"])

    def forward(x_nchw):
        B = x_nchw.shape[0]
        num_blocks = (B + tb - 1) // tb
        b_pad = num_blocks * tb
        x = jnp.transpose(x_nchw, (0, 2, 3, 1))                 # NCHW -> NHWC
        patches = _im2col_layer1(x, l0["k"], l0["s"], l0["pos_pad"])
        if b_pad != B:
            patches = jnp.pad(patches, ((0, b_pad - B), (0, 0), (0, 0)))
        # Fold batch into rows: (b_pad, pos_pad, cols) -> (b_pad*pos_pad, cols).
        patches = patches.reshape(b_pad * l0["pos_pad"], -1).astype(compute_dtype)
        call = _fused_pallas_call(plan, ops, num_blocks, tb, compute_dtype)
        out = call(patches, *flat_ops)                          # (b_pad*pos_pad_L, CoutL)
        out = out.reshape(b_pad, ll["pos_pad"], ll["cout"])[:B, :ll["n_pos"], :]
        out = out.reshape(B, ll["oh"], ll["ow"], ll["cout"])
        return jnp.transpose(out, (0, 3, 1, 2))                 # NHWC -> NCHW

    return jax.jit(forward)


def _reference_forward(x_nchw, params, kernel_size, stride):
    """Pure-JAX f32 reference (lax conv) for correctness checking."""
    x = x_nchw
    n_layers = len(kernel_size)
    for i, ((w, b), k, s) in enumerate(zip(params, kernel_size, stride)):
        x = jax.lax.conv_general_dilated(
            x, w, window_strides=(s, s), padding="VALID",
            dimension_numbers=("NCHW", "OIHW", "NCHW"))
        x = x + b[None, :, None, None]
        if i < n_layers - 1:
            x = jnp.maximum(x, 0.0)
    return x


# ---------------------------------- main ------------------------------------ #
if __name__ == "__main__":
    # Default module hyperparameters; only len(kernel_size)=3 conv layers are
    # built, so effective channels are hidden_size_list[:3] = [32, 64, 64].
    hidden_size_list = [32, 64, 64, 128]
    kernel_size = [8, 4, 3]
    stride = [4, 2, 1]

    B, C_in, H, W = 2, 4, 48, 48                      # 48 -> 11 -> 4 -> 2
    key = jax.random.PRNGKey(0)
    key, xk = jax.random.split(key)
    x = jax.random.normal(xk, (B, C_in, H, W), jnp.float32)

    params = init_params(key, C_in, hidden_size_list, kernel_size)
    plan = build_plan(C_in, hidden_size_list, kernel_size, stride, H, W)

    # Batch block size: fold TB batch elements into every matmul's M dimension.
    # B<=8 -> a single fat grid step; B>8 -> >=2 blocks (both TensorCores on v7x).
    TB = min(B, 8)

    ops = prepare_params(params, plan, TB, compute_dtype=jnp.bfloat16)
    forward = make_forward(plan, ops, TB, compute_dtype=jnp.bfloat16)
    out = jax.block_until_ready(forward(x))

    ref = jax.block_until_ready(_reference_forward(x, params, kernel_size, stride))
    assert out.shape == (B, hidden_size_list[len(kernel_size) - 1], 2, 2), out.shape
    # bf16 MXU operands with f32 accumulation vs. an all-f32 reference.
    assert jnp.allclose(out, ref, atol=3e-2, rtol=3e-2), \
        float(jnp.max(jnp.abs(out - ref)))

    print("KERNEL_OK")
</pallas_src>

<mosaic_0001>
module attributes {stable_mosaic.version = 11 : i64} {
  func.func @_fused_conv_kernel(%arg0: i32, %arg1: memref<256x256xbf16, #tpu.memory_space<vmem>>, %arg2: memref<256x32xbf16, #tpu.memory_space<vmem>>, %arg3: memref<1x32xf32, #tpu.memory_space<vmem>>, %arg4: memref<512x256xbf16, #tpu.memory_space<vmem>>, %arg5: memref<512x64xbf16, #tpu.memory_space<vmem>>, %arg6: memref<1x64xf32, #tpu.memory_space<vmem>>, %arg7: memref<288x32xbf16, #tpu.memory_space<vmem>>, %arg8: memref<576x64xbf16, #tpu.memory_space<vmem>>, %arg9: memref<1x64xf32, #tpu.memory_space<vmem>>, %arg10: memref<32x64xf32, #tpu.memory_space<vmem>>) attributes {dimension_semantics = [#tpu.dimension_semantics<parallel>], iteration_bounds = array<i64: 1>, scalar_prefetch = 0 : i64, scratch_operands = 0 : i64, tpu.core_type = #tpu.core_type<tc>, window_params = [{transform_indices = @transform_0, window_bounds = array<i64: 256, 256>}, {pipeline_mode = #tpu.pipeline_mode<synchronous>, transform_indices = @transform_1, window_bounds = array<i64: 256, 32>}, {pipeline_mode = #tpu.pipeline_mode<synchronous>, transform_indices = @transform_2, window_bounds = array<i64: 1, 32>}, {pipeline_mode = #tpu.pipeline_mode<synchronous>, transform_indices = @transform_3, window_bounds = array<i64: 512, 256>}, {pipeline_mode = #tpu.pipeline_mode<synchronous>, transform_indices = @transform_4, window_bounds = array<i64: 512, 64>}, {pipeline_mode = #tpu.pipeline_mode<synchronous>, transform_indices = @transform_5, window_bounds = array<i64: 1, 64>}, {pipeline_mode = #tpu.pipeline_mode<synchronous>, transform_indices = @transform_6, window_bounds = array<i64: 288, 32>}, {pipeline_mode = #tpu.pipeline_mode<synchronous>, transform_indices = @transform_7, window_bounds = array<i64: 576, 64>}, {pipeline_mode = #tpu.pipeline_mode<synchronous>, transform_indices = @transform_8, window_bounds = array<i64: 1, 64>}, {transform_indices = @transform_9, window_bounds = array<i64: 32, 64>}]} {
    %c0 = arith.constant 0 : index
    %c0_0 = arith.constant 0 : index
    %0 = vector.load %arg1[%c0, %c0_0] : memref<256x256xbf16, #tpu.memory_space<vmem>>, vector<256x256xbf16>
    %c0_1 = arith.constant 0 : index
    %c0_2 = arith.constant 0 : index
    %1 = vector.load %arg2[%c0_1, %c0_2] : memref<256x32xbf16, #tpu.memory_space<vmem>>, vector<256x32xbf16>
    %cst = arith.constant dense<0.000000e+00> : vector<256x32xf32>
    %2 = tpu.matmul %0, %1, %cst {dimension_numbers = #tpu.dot_dimension_numbers<[1], [0], [0], [1], [0, 0, 1, 1], [], []>} : vector<256x256xbf16>, vector<256x32xbf16>, vector<256x32xf32> -> vector<256x32xf32>
    %c0_3 = arith.constant 0 : index
    %c0_4 = arith.constant 0 : index
    %3 = vector.load %arg3[%c0_3, %c0_4] : memref<1x32xf32, #tpu.memory_space<vmem>>, vector<1x32xf32>
    %4 = vector.broadcast %3 : vector<1x32xf32> to vector<256x32xf32>
    %5 = arith.addf %2, %4 : vector<256x32xf32>
    %cst_5 = arith.constant 0.000000e+00 : f32
    %6 = vector.broadcast %cst_5 : f32 to vector<256x32xf32>
    %7 = arith.maximumf %5, %6 : vector<256x32xf32>
    %8 = arith.truncf %7 : vector<256x32xf32> to vector<256x32xbf16>
    %c0_6 = arith.constant 0 : index
    %c0_7 = arith.constant 0 : index
    %9 = vector.load %arg4[%c0_6, %c0_7] : memref<512x256xbf16, #tpu.memory_space<vmem>>, vector<512x256xbf16>
    %c0_8 = arith.constant 0 : index
    %c0_9 = arith.constant 0 : index
    %10 = vector.load %arg5[%c0_8, %c0_9] : memref<512x64xbf16, #tpu.memory_space<vmem>>, vector<512x64xbf16>
    %c0_10 = arith.constant 0 : index
    %c0_11 = arith.constant 0 : index
    %11 = vector.load %arg6[%c0_10, %c0_11] : memref<1x64xf32, #tpu.memory_space<vmem>>, vector<1x64xf32>
    %cst_12 = arith.constant dense<0.000000e+00> : vector<512x32xf32>
    %12 = tpu.matmul %9, %8, %cst_12 {dimension_numbers = #tpu.dot_dimension_numbers<[1], [0], [0], [1], [0, 0, 1, 1], [], []>} : vector<512x256xbf16>, vector<256x32xbf16>, vector<512x32xf32> -> vector<512x32xf32>
    %13 = arith.truncf %12 : vector<512x32xf32> to vector<512x32xbf16>
    %14 = vector.extract_strided_slice %13 {offsets = [0, 0], sizes = [32, 32], strides = [1, 1]} : vector<512x32xbf16> to vector<32x32xbf16>
    %15 = vector.extract_strided_slice %10 {offsets = [0, 0], sizes = [32, 64], strides = [1, 1]} : vector<512x64xbf16> to vector<32x64xbf16>
    %cst_13 = arith.constant dense<0.000000e+00> : vector<32x64xf32>
    %16 = tpu.matmul %14, %15, %cst_13 {dimension_numbers = #tpu.dot_dimension_numbers<[1], [0], [0], [1], [0, 0, 1, 1], [], []>} : vector<32x32xbf16>, vector<32x64xbf16>, vector<32x64xf32> -> vector<32x64xf32>
    %17 = vector.extract_strided_slice %13 {offsets = [32, 0], sizes = [32, 32], strides = [1, 1]} : vector<512x32xbf16> to vector<32x32xbf16>
    %18 = vector.extract_strided_slice %10 {offsets = [32, 0], sizes = [32, 64], strides = [1, 1]} : vector<512x64xbf16> to vector<32x64xbf16>
    %cst_14 = arith.constant dense<0.000000e+00> : vector<32x64xf32>
    %19 = tpu.matmul %17, %18, %cst_14 {dimension_numbers = #tpu.dot_dimension_numbers<[1], [0], [0], [1], [0, 0, 1, 1], [], []>} : vector<32x32xbf16>, vector<32x64xbf16>, vector<32x64xf32> -> vector<32x64xf32>
    %20 = arith.addf %16, %19 : vector<32x64xf32>
    %21 = vector.extract_strided_slice %13 {offsets = [64, 0], sizes = [32, 32], strides = [1, 1]} : vector<512x32xbf16> to vector<32x32xbf16>
    %22 = vector.extract_strided_slice %10 {offsets = [64, 0], sizes = [32, 64], strides = [1, 1]} : vector<512x64xbf16> to vector<32x64xbf16>
    %cst_15 = arith.constant dense<0.000000e+00> : vector<32x64xf32>
    %23 = tpu.matmul %21, %22, %cst_15 {dimension_numbers = #tpu.dot_dimension_numbers<[1], [0], [0], [1], [0, 0, 1, 1], [], []>} : vector<32x32xbf16>, vector<32x64xbf16>, vector<32x64xf32> -> vector<32x64xf32>
    %24 = arith.addf %20, %23 : vector<32x64xf32>
    %25 = vector.extract_strided_slice %13 {offsets = [96, 0], sizes = [32, 32], strides = [1, 1]} : vector<512x32xbf16> to vector<32x32xbf16>
    %26 = vector.extract_strided_slice %10 {offsets = [96, 0], sizes = [32, 64], strides = [1, 1]} : vector<512x64xbf16> to vector<32x64xbf16>
    %cst_16 = arith.constant dense<0.000000e+00> : vector<32x64xf32>
    %27 = tpu.matmul %25, %26, %cst_16 {dimension_numbers = #tpu.dot_dimension_numbers<[1], [0], [0], [1], [0, 0, 1, 1], [], []>} : vector<32x32xbf16>, vector<32x64xbf16>, vector<32x64xf32> -> vector<32x64xf32>
    %28 = arith.addf %24, %27 : vector<32x64xf32>
    %29 = vector.extract_strided_slice %13 {offsets = [128, 0], sizes = [32, 32], strides = [1, 1]} : vector<512x32xbf16> to vector<32x32xbf16>
    %30 = vector.extract_strided_slice %10 {offsets = [128, 0], sizes = [32, 64], strides = [1, 1]} : vector<512x64xbf16> to vector<32x64xbf16>
    %cst_17 = arith.constant dense<0.000000e+00> : vector<32x64xf32>
    %31 = tpu.matmul %29, %30, %cst_17 {dimension_numbers = #tpu.dot_dimension_numbers<[1], [0], [0], [1], [0, 0, 1, 1], [], []>} : vector<32x32xbf16>, vector<32x64xbf16>, vector<32x64xf32> -> vector<32x64xf32>
    %32 = arith.addf %28, %31 : vector<32x64xf32>
    %33 = vector.extract_strided_slice %13 {offsets = [160, 0], sizes = [32, 32], strides = [1, 1]} : vector<512x32xbf16> to vector<32x32xbf16>
    %34 = vector.extract_strided_slice %10 {offsets = [160, 0], sizes = [32, 64], strides = [1, 1]} : vector<512x64xbf16> to vector<32x64xbf16>
    %cst_18 = arith.constant dense<0.000000e+00> : vector<32x64xf32>
    %35 = tpu.matmul %33, %34, %cst_18 {dimension_numbers = #tpu.dot_dimension_numbers<[1], [0], [0], [1], [0, 0, 1, 1], [], []>} : vector<32x32xbf16>, vector<32x64xbf16>, vector<32x64xf32> -> vector<32x64xf32>
    %36 = arith.addf %32, %35 : vector<32x64xf32>
    %37 = vector.extract_strided_slice %13 {offsets = [192, 0], sizes = [32, 32], strides = [1, 1]} : vector<512x32xbf16> to vector<32x32xbf16>
    %38 = vector.extract_strided_slice %10 {offsets = [192, 0], sizes = [32, 64], strides = [1, 1]} : vector<512x64xbf16> to vector<32x64xbf16>
    %cst_19 = arith.constant dense<0.000000e+00> : vector<32x64xf32>
    %39 = tpu.matmul %37, %38, %cst_19 {dimension_numbers = #tpu.dot_dimension_numbers<[1], [0], [0], [1], [0, 0, 1, 1], [], []>} : vector<32x32xbf16>, vector<32x64xbf16>, vector<32x64xf32> -> vector<32x64xf32>
    %40 = arith.addf %36, %39 : vector<32x64xf32>
    %41 = vector.extract_strided_slice %13 {offsets = [224, 0], sizes = [32, 32], strides = [1, 1]} : vector<512x32xbf16> to vector<32x32xbf16>
    %42 = vector.extract_strided_slice %10 {offsets = [224, 0], sizes = [32, 64], strides = [1, 1]} : vector<512x64xbf16> to vector<32x64xbf16>
    %cst_20 = arith.constant dense<0.000000e+00> : vector<32x64xf32>
    %43 = tpu.matmul %41, %42, %cst_20 {dimension_numbers = #tpu.dot_dimension_numbers<[1], [0], [0], [1], [0, 0, 1, 1], [], []>} : vector<32x32xbf16>, vector<32x64xbf16>, vector<32x64xf32> -> vector<32x64xf32>
    %44 = arith.addf %40, %43 : vector<32x64xf32>
    %45 = vector.extract_strided_slice %13 {offsets = [256, 0], sizes = [32, 32], strides = [1, 1]} : vector<512x32xbf16> to vector<32x32xbf16>
    %46 = vector.extract_strided_slice %10 {offsets = [256, 0], sizes = [32, 64], strides = [1, 1]} : vector<512x64xbf16> to vector<32x64xbf16>
    %cst_21 = arith.constant dense<0.000000e+00> : vector<32x64xf32>
    %47 = tpu.matmul %45, %46, %cst_21 {dimension_numbers = #tpu.dot_dimension_numbers<[1], [0], [0], [1], [0, 0, 1, 1], [], []>} : vector<32x32xbf16>, vector<32x64xbf16>, vector<32x64xf32> -> vector<32x64xf32>
    %48 = arith.addf %44, %47 : vector<32x64xf32>
    %49 = vector.extract_strided_slice %13 {offsets = [288, 0], sizes = [32, 32], strides = [1, 1]} : vector<512x32xbf16> to vector<32x32xbf16>
    %50 = vector.extract_strided_slice %10 {offsets = [288, 0], sizes = [32, 64], strides = [1, 1]} : vector<512x64xbf16> to vector<32x64xbf16>
    %cst_22 = arith.constant dense<0.000000e+00> : vector<32x64xf32>
    %51 = tpu.matmul %49, %50, %cst_22 {dimension_numbers = #tpu.dot_dimension_numbers<[1], [0], [0], [1], [0, 0, 1, 1], [], []>} : vector<32x32xbf16>, vector<32x64xbf16>, vector<32x64xf32> -> vector<32x64xf32>
    %52 = arith.addf %48, %51 : vector<32x64xf32>
    %53 = vector.extract_strided_slice %13 {offsets = [320, 0], sizes = [32, 32], strides = [1, 1]} : vector<512x32xbf16> to vector<32x32xbf16>
    %54 = vector.extract_strided_slice %10 {offsets = [320, 0], sizes = [32, 64], strides = [1, 1]} : vector<512x64xbf16> to vector<32x64xbf16>
    %cst_23 = arith.constant dense<0.000000e+00> : vector<32x64xf32>
    %55 = tpu.matmul %53, %54, %cst_23 {dimension_numbers = #tpu.dot_dimension_numbers<[1], [0], [0], [1], [0, 0, 1, 1], [], []>} : vector<32x32xbf16>, vector<32x64xbf16>, vector<32x64xf32> -> vector<32x64xf32>
    %56 = arith.addf %52, %55 : vector<32x64xf32>
    %57 = vector.extract_strided_slice %13 {offsets = [352, 0], sizes = [32, 32], strides = [1, 1]} : vector<512x32xbf16> to vector<32x32xbf16>
    %58 = vector.extract_strided_slice %10 {offsets = [352, 0], sizes = [32, 64], strides = [1, 1]} : vector<512x64xbf16> to vector<32x64xbf16>
    %cst_24 = arith.constant dense<0.000000e+00> : vector<32x64xf32>
    %59 = tpu.matmul %57, %58, %cst_24 {dimension_numbers = #tpu.dot_dimension_numbers<[1], [0], [0], [1], [0, 0, 1, 1], [], []>} : vector<32x32xbf16>, vector<32x64xbf16>, vector<32x64xf32> -> vector<32x64xf32>
    %60 = arith.addf %56, %59 : vector<32x64xf32>
    %61 = vector.extract_strided_slice %13 {offsets = [384, 0], sizes = [32, 32], strides = [1, 1]} : vector<512x32xbf16> to vector<32x32xbf16>
    %62 = vector.extract_strided_slice %10 {offsets = [384, 0], sizes = [32, 64], strides = [1, 1]} : vector<512x64xbf16> to vector<32x64xbf16>
    %cst_25 = arith.constant dense<0.000000e+00> : vector<32x64xf32>
    %63 = tpu.matmul %61, %62, %cst_25 {dimension_numbers = #tpu.dot_dimension_numbers<[1], [0], [0], [1], [0, 0, 1, 1], [], []>} : vector<32x32xbf16>, vector<32x64xbf16>, vector<32x64xf32> -> vector<32x64xf32>
    %64 = arith.addf %60, %63 : vector<32x64xf32>
    %65 = vector.extract_strided_slice %13 {offsets = [416, 0], sizes = [32, 32], strides = [1, 1]} : vector<512x32xbf16> to vector<32x32xbf16>
    %66 = vector.extract_strided_slice %10 {offsets = [416, 0], sizes = [32, 64], strides = [1, 1]} : vector<512x64xbf16> to vector<32x64xbf16>
    %cst_26 = arith.constant dense<0.000000e+00> : vector<32x64xf32>
    %67 = tpu.matmul %65, %66, %cst_26 {dimension_numbers = #tpu.dot_dimension_numbers<[1], [0], [0], [1], [0, 0, 1, 1], [], []>} : vector<32x32xbf16>, vector<32x64xbf16>, vector<32x64xf32> -> vector<32x64xf32>
    %68 = arith.addf %64, %67 : vector<32x64xf32>
    %69 = vector.extract_strided_slice %13 {offsets = [448, 0], sizes = [32, 32], strides = [1, 1]} : vector<512x32xbf16> to vector<32x32xbf16>
    %70 = vector.extract_strided_slice %10 {offsets = [448, 0], sizes = [32, 64], strides = [1, 1]} : vector<512x64xbf16> to vector<32x64xbf16>
    %cst_27 = arith.constant dense<0.000000e+00> : vector<32x64xf32>
    %71 = tpu.matmul %69, %70, %cst_27 {dimension_numbers = #tpu.dot_dimension_numbers<[1], [0], [0], [1], [0, 0, 1, 1], [], []>} : vector<32x32xbf16>, vector<32x64xbf16>, vector<32x64xf32> -> vector<32x64xf32>
    %72 = arith.addf %68, %71 : vector<32x64xf32>
    %73 = vector.extract_strided_slice %13 {offsets = [480, 0], sizes = [32, 32], strides = [1, 1]} : vector<512x32xbf16> to vector<32x32xbf16>
    %74 = vector.extract_strided_slice %10 {offsets = [480, 0], sizes = [32, 64], strides = [1, 1]} : vector<512x64xbf16> to vector<32x64xbf16>
    %cst_28 = arith.constant dense<0.000000e+00> : vector<32x64xf32>
    %75 = tpu.matmul %73, %74, %cst_28 {dimension_numbers = #tpu.dot_dimension_numbers<[1], [0], [0], [1], [0, 0, 1, 1], [], []>} : vector<32x32xbf16>, vector<32x64xbf16>, vector<32x64xf32> -> vector<32x64xf32>
    %76 = arith.addf %72, %75 : vector<32x64xf32>
    %77 = vector.broadcast %11 : vector<1x64xf32> to vector<32x64xf32>
    %78 = arith.addf %76, %77 : vector<32x64xf32>
    %cst_29 = arith.constant 0.000000e+00 : f32
    %79 = vector.broadcast %cst_29 : f32 to vector<32x64xf32>
    %80 = arith.maximumf %78, %79 : vector<32x64xf32>
    %81 = arith.truncf %80 : vector<32x64xf32> to vector<32x64xbf16>
    %c0_30 = arith.constant 0 : index
    %c0_31 = arith.constant 0 : index
    %82 = vector.load %arg7[%c0_30, %c0_31] : memref<288x32xbf16, #tpu.memory_space<vmem>>, vector<288x32xbf16>
    %c0_32 = arith.constant 0 : index
    %c0_33 = arith.constant 0 : index
    %83 = vector.load %arg8[%c0_32, %c0_33] : memref<576x64xbf16, #tpu.memory_space<vmem>>, vector<576x64xbf16>
    %c0_34 = arith.constant 0 : index
    %c0_35 = arith.constant 0 : index
    %84 = vector.load %arg9[%c0_34, %c0_35] : memref<1x64xf32, #tpu.memory_space<vmem>>, vector<1x64xf32>
    %cst_36 = arith.constant dense<0.000000e+00> : vector<288x64xf32>
    %85 = tpu.matmul %82, %81, %cst_36 {dimension_numbers = #tpu.dot_dimension_numbers<[1], [0], [0], [1], [0, 0, 1, 1], [], []>} : vector<288x32xbf16>, vector<32x64xbf16>, vector<288x64xf32> -> vector<288x64xf32>
    %86 = arith.truncf %85 : vector<288x64xf32> to vector<288x64xbf16>
    %87 = vector.extract_strided_slice %86 {offsets = [0, 0], sizes = [32, 64], strides = [1, 1]} : vector<288x64xbf16> to vector<32x64xbf16>
    %88 = vector.extract_strided_slice %83 {offsets = [0, 0], sizes = [64, 64], strides = [1, 1]} : vector<576x64xbf16> to vector<64x64xbf16>
    %cst_37 = arith.constant dense<0.000000e+00> : vector<32x64xf32>
    %89 = tpu.matmul %87, %88, %cst_37 {dimension_numbers = #tpu.dot_dimension_numbers<[1], [0], [0], [1], [0, 0, 1, 1], [], []>} : vector<32x64xbf16>, vector<64x64xbf16>, vector<32x64xf32> -> vector<32x64xf32>
    %90 = vector.extract_strided_slice %86 {offsets = [32, 0], sizes = [32, 64], strides = [1, 1]} : vector<288x64xbf16> to vector<32x64xbf16>
    %91 = vector.extract_strided_slice %83 {offsets = [64, 0], sizes = [64, 64], strides = [1, 1]} : vector<576x64xbf16> to vector<64x64xbf16>
    %cst_38 = arith.constant dense<0.000000e+00> : vector<32x64xf32>
    %92 = tpu.matmul %90, %91, %cst_38 {dimension_numbers = #tpu.dot_dimension_numbers<[1], [0], [0], [1], [0, 0, 1, 1], [], []>} : vector<32x64xbf16>, vector<64x64xbf16>, vector<32x64xf32> -> vector<32x64xf32>
    %93 = arith.addf %89, %92 : vector<32x64xf32>
    %94 = vector.extract_strided_slice %86 {offsets = [64, 0], sizes = [32, 64], strides = [1, 1]} : vector<288x64xbf16> to vector<32x64xbf16>
    %95 = vector.extract_strided_slice %83 {offsets = [128, 0], sizes = [64, 64], strides = [1, 1]} : vector<576x64xbf16> to vector<64x64xbf16>
    %cst_39 = arith.constant dense<0.000000e+00> : vector<32x64xf32>
    %96 = tpu.matmul %94, %95, %cst_39 {dimension_numbers = #tpu.dot_dimension_numbers<[1], [0], [0], [1], [0, 0, 1, 1], [], []>} : vector<32x64xbf16>, vector<64x64xbf16>, vector<32x64xf32> -> vector<32x64xf32>
    %97 = arith.addf %93, %96 : vector<32x64xf32>
    %98 = vector.extract_strided_slice %86 {offsets = [96, 0], sizes = [32, 64], strides = [1, 1]} : vector<288x64xbf16> to vector<32x64xbf16>
    %99 = vector.extract_strided_slice %83 {offsets = [192, 0], sizes = [64, 64], strides = [1, 1]} : vector<576x64xbf16> to vector<64x64xbf16>
    %cst_40 = arith.constant dense<0.000000e+00> : vector<32x64xf32>
    %100 = tpu.matmul %98, %99, %cst_40 {dimension_numbers = #tpu.dot_dimension_numbers<[1], [0], [0], [1], [0, 0, 1, 1], [], []>} : vector<32x64xbf16>, vector<64x64xbf16>, vector<32x64xf32> -> vector<32x64xf32>
    %101 = arith.addf %97, %100 : vector<32x64xf32>
    %102 = vector.extract_strided_slice %86 {offsets = [128, 0], sizes = [32, 64], strides = [1, 1]} : vector<288x64xbf16> to vector<32x64xbf16>
    %103 = vector.extract_strided_slice %83 {offsets = [256, 0], sizes = [64, 64], strides = [1, 1]} : vector<576x64xbf16> to vector<64x64xbf16>
    %cst_41 = arith.constant dense<0.000000e+00> : vector<32x64xf32>
    %104 = tpu.matmul %102, %103, %cst_41 {dimension_numbers = #tpu.dot_dimension_numbers<[1], [0], [0], [1], [0, 0, 1, 1], [], []>} : vector<32x64xbf16>, vector<64x64xbf16>, vector<32x64xf32> -> vector<32x64xf32>
    %105 = arith.addf %101, %104 : vector<32x64xf32>
    %106 = vector.extract_strided_slice %86 {offsets = [160, 0], sizes = [32, 64], strides = [1, 1]} : vector<288x64xbf16> to vector<32x64xbf16>
    %107 = vector.extract_strided_slice %83 {offsets = [320, 0], sizes = [64, 64], strides = [1, 1]} : vector<576x64xbf16> to vector<64x64xbf16>
    %cst_42 = arith.constant dense<0.000000e+00> : vector<32x64xf32>
    %108 = tpu.matmul %106, %107, %cst_42 {dimension_numbers = #tpu.dot_dimension_numbers<[1], [0], [0], [1], [0, 0, 1, 1], [], []>} : vector<32x64xbf16>, vector<64x64xbf16>, vector<32x64xf32> -> vector<32x64xf32>
    %109 = arith.addf %105, %108 : vector<32x64xf32>
    %110 = vector.extract_strided_slice %86 {offsets = [192, 0], sizes = [32, 64], strides = [1, 1]} : vector<288x64xbf16> to vector<32x64xbf16>
    %111 = vector.extract_strided_slice %83 {offsets = [384, 0], sizes = [64, 64], strides = [1, 1]} : vector<576x64xbf16> to vector<64x64xbf16>
    %cst_43 = arith.constant dense<0.000000e+00> : vector<32x64xf32>
    %112 = tpu.matmul %110, %111, %cst_43 {dimension_numbers = #tpu.dot_dimension_numbers<[1], [0], [0], [1], [0, 0, 1, 1], [], []>} : vector<32x64xbf16>, vector<64x64xbf16>, vector<32x64xf32> -> vector<32x64xf32>
    %113 = arith.addf %109, %112 : vector<32x64xf32>
    %114 = vector.extract_strided_slice %86 {offsets = [224, 0], sizes = [32, 64], strides = [1, 1]} : vector<288x64xbf16> to vector<32x64xbf16>
    %115 = vector.extract_strided_slice %83 {offsets = [448, 0], sizes = [64, 64], strides = [1, 1]} : vector<576x64xbf16> to vector<64x64xbf16>
    %cst_44 = arith.constant dense<0.000000e+00> : vector<32x64xf32>
    %116 = tpu.matmul %114, %115, %cst_44 {dimension_numbers = #tpu.dot_dimension_numbers<[1], [0], [0], [1], [0, 0, 1, 1], [], []>} : vector<32x64xbf16>, vector<64x64xbf16>, vector<32x64xf32> -> vector<32x64xf32>
    %117 = arith.addf %113, %116 : vector<32x64xf32>
    %118 = vector.extract_strided_slice %86 {offsets = [256, 0], sizes = [32, 64], strides = [1, 1]} : vector<288x64xbf16> to vector<32x64xbf16>
    %119 = vector.extract_strided_slice %83 {offsets = [512, 0], sizes = [64, 64], strides = [1, 1]} : vector<576x64xbf16> to vector<64x64xbf16>
    %cst_45 = arith.constant dense<0.000000e+00> : vector<32x64xf32>
    %120 = tpu.matmul %118, %119, %cst_45 {dimension_numbers = #tpu.dot_dimension_numbers<[1], [0], [0], [1], [0, 0, 1, 1], [], []>} : vector<32x64xbf16>, vector<64x64xbf16>, vector<32x64xf32> -> vector<32x64xf32>
    %121 = arith.addf %117, %120 : vector<32x64xf32>
    %122 = vector.broadcast %84 : vector<1x64xf32> to vector<32x64xf32>
    %123 = arith.addf %121, %122 : vector<32x64xf32>
    %c0_46 = arith.constant 0 : index
    %c0_47 = arith.constant 0 : index
    %124 = vector.load %arg10[%c0_46, %c0_47] : memref<32x64xf32, #tpu.memory_space<vmem>>, vector<32x64xf32>
    tpu.vector_store %arg10[%c0_46, %c0_47], %123 {strides = array<i32>} : memref<32x64xf32, #tpu.memory_space<vmem>>, vector<32x64xf32>,
    return
  }
  func.func @transform_0(%arg0: i32) -> (i32, i32) {
    %c0_i32 = arith.constant 0 : i32
    %c0_i32_0 = arith.constant 0 : i32
    return %arg0, %c0_i32 : i32, i32
  }
  func.func @transform_1(%arg0: i32) -> (i32, i32) {
    %c0_i32 = arith.constant 0 : i32
    %c0_i32_0 = arith.constant 0 : i32
    %c0_i32_1 = arith.constant 0 : i32
    return %c0_i32, %c0_i32_0 : i32, i32
  }
  func.func @transform_2(%arg0: i32) -> (i32, i32) {
    %c0_i32 = arith.constant 0 : i32
    %c0_i32_0 = arith.constant 0 : i32
    %c0_i32_1 = arith.constant 0 : i32
    return %c0_i32, %c0_i32_0 : i32, i32
  }
  func.func @transform_3(%arg0: i32) -> (i32, i32) {
    %c0_i32 = arith.constant 0 : i32
    %c0_i32_0 = arith.constant 0 : i32
    %c0_i32_1 = arith.constant 0 : i32
    return %c0_i32, %c0_i32_0 : i32, i32
  }
  func.func @transform_4(%arg0: i32) -> (i32, i32) {
    %c0_i32 = arith.constant 0 : i32
    %c0_i32_0 = arith.constant 0 : i32
    %c0_i32_1 = arith.constant 0 : i32
    return %c0_i32, %c0_i32_0 : i32, i32
  }
  func.func @transform_5(%arg0: i32) -> (i32, i32) {
    %c0_i32 = arith.constant 0 : i32
    %c0_i32_0 = arith.constant 0 : i32
    %c0_i32_1 = arith.constant 0 : i32
    return %c0_i32, %c0_i32_0 : i32, i32
  }
  func.func @transform_6(%arg0: i32) -> (i32, i32) {
    %c0_i32 = arith.constant 0 : i32
    %c0_i32_0 = arith.constant 0 : i32
    %c0_i32_1 = arith.constant 0 : i32
    return %c0_i32, %c0_i32_0 : i32, i32
  }
  func.func @transform_7(%arg0: i32) -> (i32, i32) {
    %c0_i32 = arith.constant 0 : i32
    %c0_i32_0 = arith.constant 0 : i32
    %c0_i32_1 = arith.constant 0 : i32
    return %c0_i32, %c0_i32_0 : i32, i32
  }
  func.func @transform_8(%arg0: i32) -> (i32, i32) {
    %c0_i32 = arith.constant 0 : i32
    %c0_i32_0 = arith.constant 0 : i32
    %c0_i32_1 = arith.constant 0 : i32
    return %c0_i32, %c0_i32_0 : i32, i32
  }
  func.func @transform_9(%arg0: i32) -> (i32, i32) {
    %c0_i32 = arith.constant 0 : i32
    %c0_i32_0 = arith.constant 0 : i32
    return %arg0, %c0_i32 : i32, i32
  }
}

</mosaic_0001>

<bundles_post_ra>
// kernel: forward.1
= control target key start
LH: loop header
LB: loop body
LE: loop exit
PB: predicated region body
PF: predicated region fallthrough
CT: control target
= control target key end

     0   :  { %vm1456_vm0 = vcmask 261120   ;;  %vm2678_vm1 = vcmask 523264   ;;  %s5540_s1 = inlined_call_operand.vmem [shape: bf16[256,32], index: 1, kind: input, shape index: {}]   ;;  %s5541_s2 = inlined_call_operand.vmem [shape: f32[1,32], index: 2, kind: input, shape index: {}]   ;;  %s5542_s0 = inlined_call_operand.vmem [shape: bf16[256,256], index: 0, kind: input, shape index: {}]   ;;  %s5543_s3 = inlined_call_operand.vmem [shape: bf16[512,256], index: 3, kind: input, shape index: {}]   ;;  %s5544_s4 = inlined_call_operand.vmem [shape: bf16[512,64], index: 4, kind: input, shape index: {}]   ;;  %s5545_s7 = inlined_call_operand.vmem [shape: bf16[576,64], index: 7, kind: input, shape index: {}]   ;;  %s5546_s5 = inlined_call_operand.vmem [shape: f32[1,64], index: 5, kind: input, shape index: {}]   ;;  %s5547_s6 = inlined_call_operand.vmem [shape: bf16[288,32], index: 6, kind: input, shape index: {}]   ;;  %s5548_s8 = inlined_call_operand.vmem [shape: f32[1,64], index: 8, kind: input, shape index: {}]   ;;  %s5549_s9 = inlined_call_operand.vmem [shape: f32[32,64], index: 9, kind: output, shape index: {}]  }
   0x1   :  { %v4118_v0 = vld [vmem:[%s5540_s1 + $0x38] sm:$0xff]  ;;  %v4117_v1 = vld [vmem:[%s5540_s1 + $0x30] sm:$0xff]  ;;  %v4116_v2 = vld [vmem:[%s5540_s1 + $0x28] sm:$0xff] }
   0x2   :  { %4277 = vmatpush.bf16.msra.mxu1 %v4118_v0  ;;  %357 = vmatpush.bf16.msra.mxu0 %v4118_v0  ;;  %v4115_v3 = vld [vmem:[%s5540_s1 + $0x20] sm:$0xff]  ;;  %v4114_v4 = vld [vmem:[%s5540_s1 + $0x18] sm:$0xff]  ;;  %v4113_v5 = vld [vmem:[%s5540_s1 + $0x10] sm:$0xff] }
   0x3   :  { %4278 = vmatpush.bf16.msra.mxu2 %v4118_v0  ;;  %4279 = vmatpush.bf16.msra.mxu3 %v4118_v0  ;;  %v4112_v6 = vld [vmem:[%s5540_s1 + $0x8] sm:$0xff]  ;;  %v4111_v7 = vld [vmem:[%s5540_s1] sm:$0xff]  ;;  %v3277_v8 = vld [vmem:[%s5542_s0 + $0x70] sm:$0xf] }
   0x4   :  { %v4094_v9 = vld [vmem:[%s5542_s0 + $0x74] sm:$0xf0]  ;;  %v4125_v12 = vld [vmem:[%s5540_s1 + $0x70] sm:$0xff]  ;;  %v3221_v13 = vld [vmem:[%s5542_s0] sm:$0xf] }
   0x5   :  { %v4126_v10 = vld [vmem:[%s5540_s1 + $0x78] sm:$0xff]  ;;  %v3278_v11 = vor.u32 %v4094_v9, %v3277_v8  ;;  %v4080_v14 = vld [vmem:[%s5542_s0 + $0x4] sm:$0xf0]  ;;  %v4123_v17 = vld [vmem:[%s5540_s1 + $0x60] sm:$0xff] }
   0x6   :  { %4280 = vmatpush.bf16.msra.mxu1 %v4117_v1  ;;  %358 = vmatpush.bf16.msra.mxu0 %v4117_v1  ;;  %v4124_v15 = vld [vmem:[%s5540_s1 + $0x68] sm:$0xff]  ;;  %v3222_v16 = vor.u32 %v4080_v14, %v3221_v13  ;;  %v3285_v18 = vld [vmem:[%s5542_s0 + $0x80] sm:$0xf]  ;;  %v4122_v20 = vld [vmem:[%s5540_s1 + $0x58] sm:$0xff] }
   0x7   :  { %4281 = vmatpush.bf16.msra.mxu2 %v4117_v1  ;;  %4282 = vmatpush.bf16.msra.mxu3 %v4117_v1  ;;  %v4096_v19 = vld [vmem:[%s5542_s0 + $0x84] sm:$0xf0]  ;;  %v4121_v22 = vld [vmem:[%s5540_s1 + $0x50] sm:$0xff]  ;;  %v4082_v24 = vld [vmem:[%s5542_s0 + $0x14] sm:$0xf0] }
   0x8   :  { %v3286_v21 = vor.u32 %v4096_v19, %v3285_v18  ;;  %v3229_v23 = vld [vmem:[%s5542_s0 + $0x10] sm:$0xf]  ;;  %v4120_v26 = vld [vmem:[%s5540_s1 + $0x48] sm:$0xff]  ;;  %v4119_v27 = vld [vmem:[%s5540_s1 + $0x40] sm:$0xff] }
   0x9   :  { %v3230_v25 = vor.u32 %v4082_v24, %v3229_v23  ;;  %v3293_v28 = vld [vmem:[%s5542_s0 + $0x90] sm:$0xf]  ;;  %v4098_v29 = vld [vmem:[%s5542_s0 + $0x94] sm:$0xf0]  ;;  %v3237_v31 = vld [vmem:[%s5542_s0 + $0x20] sm:$0xf] }
   0xa   :  { %4283 = vmatpush.bf16.msra.mxu1 %v4116_v2  ;;  %359 = vmatpush.bf16.msra.mxu0 %v4116_v2  ;;  %v3294_v30 = vor.u32 %v4098_v29, %v3293_v28  ;;  %v4084_v32 = vld [vmem:[%s5542_s0 + $0x24] sm:$0xf0]  ;;  %v4079_v34 = vld [vmem:[%s5542_s0 + $0x4] sm:$0xf]  ;;  %v3223_v35 = vld [vmem:[%s5542_s0 + $0x8] sm:$0xf0] }
   0xb   :  { %4284 = vmatpush.bf16.msra.mxu2 %v4116_v2  ;;  %4285 = vmatpush.bf16.msra.mxu3 %v4116_v2  ;;  %v3238_v33 = vor.u32 %v4084_v32, %v3237_v31  ;;  %v3226_v36 = vor.u32 %v4079_v34, %v3223_v35  ;;  %v3245_v37 = vld [vmem:[%s5542_s0 + $0x30] sm:$0xf]  ;;  %v4086_v38 = vld [vmem:[%s5542_s0 + $0x34] sm:$0xf0]  ;;  %v4081_v40 = vld [vmem:[%s5542_s0 + $0x14] sm:$0xf] }
   0xc   :  { %v3246_v39 = vor.u32 %v4086_v38, %v3245_v37  ;;  %v3231_v41 = vld [vmem:[%s5542_s0 + $0x18] sm:$0xf0]  ;;  %v3253_v43 = vld [vmem:[%s5542_s0 + $0x40] sm:$0xf]  ;;  %v4088_v44 = vld [vmem:[%s5542_s0 + $0x44] sm:$0xf0] }
   0xd   :  { %v3234_v42 = vor.u32 %v4081_v40, %v3231_v41  ;;  %v3254_v45 = vor.u32 %v4088_v44, %v3253_v43  ;;  %v4083_v46 = vld [vmem:[%s5542_s0 + $0x24] sm:$0xf]  ;;  %v3239_v47 = vld [vmem:[%s5542_s0 + $0x28] sm:$0xf0]  ;;  %v4085_v49 = vld [vmem:[%s5542_s0 + $0x34] sm:$0xf] }
   0xe   :  { %4286 = vmatpush.bf16.msra.mxu1 %v4115_v3  ;;  %360 = vmatpush.bf16.msra.mxu0 %v4115_v3  ;;  %v3242_v48 = vor.u32 %v4083_v46, %v3239_v47  ;;  %v3247_v50 = vld [vmem:[%s5542_s0 + $0x38] sm:$0xf0]  ;;  %v3261_v51 = vld [vmem:[%s5542_s0 + $0x50] sm:$0xf]  ;;  %v4090_v52 = vld [vmem:[%s5542_s0 + $0x54] sm:$0xf0] }
   0xf   :  { %4287 = vmatpush.bf16.msra.mxu2 %v4115_v3  ;;  %4288 = vmatpush.bf16.msra.mxu3 %v4115_v3  ;;  %v3250_v53 = vor.u32 %v4085_v49, %v3247_v50  ;;  %v3262_v54 = vor.u32 %v4090_v52, %v3261_v51  ;;  %v4087_v55 = vld [vmem:[%s5542_s0 + $0x44] sm:$0xf]  ;;  %v3255_v56 = vld [vmem:[%s5542_s0 + $0x48] sm:$0xf0]  ;;  %v3269_v57 = vld [vmem:[%s5542_s0 + $0x60] sm:$0xf] }
  0x10   :  { %v4092_v58 = vld [vmem:[%s5542_s0 + $0x64] sm:$0xf0]  ;;  %v3258_v59 = vor.u32 %v4087_v55, %v3255_v56  ;;  %v4089_v61 = vld [vmem:[%s5542_s0 + $0x54] sm:$0xf]  ;;  %v3263_v62 = vld [vmem:[%s5542_s0 + $0x58] sm:$0xf0] }
  0x11   :  { %v3270_v60 = vor.u32 %v4092_v58, %v3269_v57  ;;  %v3266_v63 = vor.u32 %v4089_v61, %v3263_v62  ;;  %v4091_v2 = vld [vmem:[%s5542_s0 + $0x64] sm:$0xf]  ;;  %v3271_v3 = vld [vmem:[%s5542_s0 + $0x68] sm:$0xf0]  ;;  %v3279_v8 = vld [vmem:[%s5542_s0 + $0x78] sm:$0xf0] }
  0x12   :  { %4289 = vmatpush.bf16.msra.mxu1 %v4114_v4  ;;  %361 = vmatpush.bf16.msra.mxu0 %v4114_v4  ;;  %v3301_v14 = vld [vmem:[%s5542_s0 + $0xa0] sm:$0xf]  ;;  %v4095_v18 = vld [vmem:[%s5542_s0 + $0x84] sm:$0xf]  ;;  %v3287_v19 = vld [vmem:[%s5542_s0 + $0x88] sm:$0xf0] }
  0x13   :  { %4290 = vmatpush.bf16.msra.mxu2 %v4114_v4  ;;  %4291 = vmatpush.bf16.msra.mxu3 %v4114_v4  ;;  %v3274_v4 = vor.u32 %v4091_v2, %v3271_v3  ;;  %v4102_v28 = vld [vmem:[%s5542_s0 + $0xb4] sm:$0xf0]  ;;  %v4097_v34 = vld [vmem:[%s5542_s0 + $0x94] sm:$0xf]  ;;  %v3295_v35 = vld [vmem:[%s5542_s0 + $0x98] sm:$0xf0] }
  0x14   :  { %v3298_v38 = vor.u32 %v4097_v34, %v3295_v35  ;;  %v3317_v44 = vld [vmem:[%s5542_s0 + $0xc0] sm:$0xf]  ;;  %v4099_v50 = vld [vmem:[%s5542_s0 + $0xa4] sm:$0xf]  ;;  %v3303_v51 = vld [vmem:[%s5542_s0 + $0xa8] sm:$0xf0] }
  0x15   :  { %v3306_v55 = vor.u32 %v4099_v50, %v3303_v51  ;;  %v3325_v57 = vld [vmem:[%s5542_s0 + $0xd0] sm:$0xf]  ;;  %v4106_v58 = vld [vmem:[%s5542_s0 + $0xd4] sm:$0xf0]  ;;  %v4109_v51 = vld [vmem:[%s5542_s0 + $0xf4] sm:$0xf] }
  0x16   :  { %4292 = vmatpush.bf16.msra.mxu1 %v4113_v5  ;;  %362 = vmatpush.bf16.msra.mxu0 %v4113_v5 }
  0x17   :  { %4293 = vmatpush.bf16.msra.mxu2 %v4113_v5  ;;  %4294 = vmatpush.bf16.msra.mxu3 %v4113_v5 }
  0x1a   :  { %4295 = vmatpush.bf16.msra.mxu1 %v4112_v6  ;;  %363 = vmatpush.bf16.msra.mxu0 %v4112_v6 }
  0x1b   :  { %4296 = vmatpush.bf16.msra.mxu2 %v4112_v6  ;;  %4297 = vmatpush.bf16.msra.mxu3 %v4112_v6 }
  0x1e   :  { %4298 = vmatpush.bf16.msra.mxu1 %v4111_v7  ;;  %364 = vmatpush.bf16.msra.mxu0 %v4111_v7 }
  0x1f   :  { %4299 = vmatpush.bf16.msra.mxu2 %v4111_v7  ;;  %4300 = vmatpush.bf16.msra.mxu3 %v4111_v7  ;;  %v4093_v7 = vld [vmem:[%s5542_s0 + $0x74] sm:$0xf] }
  0x21   :  { %400 = vmatmul.bf16.vlgmr.msra.gmra.mxu1 %v3278_v11  ;;  %365 = vmatmul.bf16.vlgmr.msra.gmra.mxu0 %v3222_v16 }
  0x22   :  { %446 = vmatpush.bf16.msrb.mxu1 %v4126_v10  ;;  %v3282_v10 = vor.u32 %v4093_v7, %v3279_v8  ;;  %v4101_v7 = vld [vmem:[%s5542_s0 + $0xb4] sm:$0xf]  ;;  %v3311_v8 = vld [vmem:[%s5542_s0 + $0xb8] sm:$0xf0] }
  0x26   :  { %447 = vmatpush.bf16.msrb.mxu1 %v4125_v12 }
  0x2a   :  { %448 = vmatpush.bf16.msrb.mxu1 %v4124_v15  ;;  %v4100_v15 = vld [vmem:[%s5542_s0 + $0xa4] sm:$0xf0] }
  0x2b   :  { %v3302_v16 = vor.u32 %v4100_v15, %v3301_v14  ;;  %v3333_v15 = vld [vmem:[%s5542_s0 + $0xe0] sm:$0xf] }
  0x2d   :  { %415 = vmatmul.bf16.vlgmr.msra.gmra.mxu2 %v3302_v16  ;;  %v4108_v16 = vld [vmem:[%s5542_s0 + $0xe4] sm:$0xf0] }
  0x2e   :  { %449 = vmatpush.bf16.msrb.mxu1 %v4123_v17  ;;  %v4531_v17 = vld [vmem:[%s5541_s2] ss:$0 sm:$0xff] }
  0x31   :  { %405 = vmatmul.bf16.gmra.mxu1 %v3286_v21  ;;  %370 = vmatmul.bf16.gmra.mxu0 %v3230_v25  ;;  %v3290_v21 = vor.u32 %v4095_v18, %v3287_v19  ;;  %v3334_v19 = vor.u32 %v4108_v16, %v3333_v15 }
  0x32   :  { %450 = vmatpush.bf16.msrb.mxu1 %v4122_v20 }
  0x36   :  { %451 = vmatpush.bf16.msrb.mxu1 %v4121_v22 }
  0x3a   :  { %452 = vmatpush.bf16.msrb.mxu1 %v4120_v26 }
  0x3e   :  { %453 = vmatpush.bf16.msrb.mxu1 %v4119_v27  ;;  %v3309_v27 = vld [vmem:[%s5542_s0 + $0xb0] sm:$0xf] }
  0x41   :  { %410 = vmatmul.bf16.gmra.mxu1 %v3294_v30  ;;  %375 = vmatmul.bf16.gmra.mxu0 %v3238_v33  ;;  %v3310_v30 = vor.u32 %v4102_v28, %v3309_v27  ;;  %v3319_v27 = vld [vmem:[%s5542_s0 + $0xc8] sm:$0xf0] }
  0x43   :  { %420 = vmatmul.bf16.gmra.mxu2 %v3310_v30 }
  0x51   :  { %454 = vmatmul.bf16.vlgmr.msrb.gmra.mxu1 %v3226_v36  ;;  %380 = vmatmul.bf16.gmra.mxu0 %v3246_v39 }
  0x61   :  { %459 = vmatmul.bf16.gmra.mxu1 %v3234_v42  ;;  %385 = vmatmul.bf16.gmra.mxu0 %v3254_v45  ;;  %v4104_v45 = vld [vmem:[%s5542_s0 + $0xc4] sm:$0xf0] }
  0x62   :  { %v3318_v47 = vor.u32 %v4104_v45, %v3317_v44  ;;  %v4107_v44 = vld [vmem:[%s5542_s0 + $0xe4] sm:$0xf]  ;;  %v3335_v45 = vld [vmem:[%s5542_s0 + $0xe8] sm:$0xf0] }
  0x64   :  { %425 = vmatmul.bf16.gmra.mxu2 %v3318_v47  ;;  %v3338_v47 = vor.u32 %v4107_v44, %v3335_v45 }
  0x71   :  { %464 = vmatmul.bf16.gmra.mxu1 %v3242_v48  ;;  %390 = vmatmul.bf16.gmra.mxu0 %v3262_v54 }
  0x81   :  { %469 = vmatmul.bf16.gmra.mxu1 %v3250_v53  ;;  %395 = vmatmul.bf16.gmra.mxu0 %v3270_v60  ;;  %v3326_v60 = vor.u32 %v4106_v58, %v3325_v57 }
  0x83   :  { %430 = vmatmul.bf16.vlgmr.msra.gmra.mxu3 %v3326_v60 }
  0x91   :  { %474 = vmatmul.bf16.gmra.mxu1 %v3258_v59 }
  0x93   :  { %435 = vmatmul.bf16.gmra.mxu3 %v3334_v19 }
  0x9e   :  { %v4498_v0 = vpop.f32.mrf.mxu1  ;;  %v366_v9 = vpop.f32.mrf.mxu0 }
  0x9f   :  { %v367_v20 = vadd.f32 %v4531_v17, %v366_v9  ;;  %v402_v57 = vadd.f32 %v4531_v17, %v4498_v0 }
  0xa1   :  { %479 = vmatmul.bf16.gmra.mxu1 %v3266_v63 }
  0xa6   :  { %v4500_v1 = vpop.f32.mrf.mxu1  ;;  %v368_v12 = vpop.f32.mrf.mxu0 }
  0xa7   :  { %v369_v25 = vadd.f32 %v4531_v17, %v368_v12  ;;  %v3314_v12 = vor.u32 %v4101_v7, %v3311_v8 }
  0xae   :  { %v4508_v5 = vpop.f32.mrf.mxu1  ;;  %v371_v23 = vpop.f32.mrf.mxu0 }
  0xaf   :  { %v372_v36 = vadd.f32 %v4531_v17, %v371_v23 }
  0xb1   :  { %484 = vmatmul.bf16.gmra.mxu1 %v3274_v4 }
  0xb6   :  { %v4510_v6 = vpop.f32.mrf.mxu1  ;;  %v373_v31 = vpop.f32.mrf.mxu0 }
  0xb7   :  { %v374_v42 = vadd.f32 %v4531_v17, %v373_v31 }
  0xbe   :  { %v4518_v11 = vpop.f32.mrf.mxu1  ;;  %v376_v41 = vpop.f32.mrf.mxu0 }
  0xbf   :  { %v377_v52 = vadd.f32 %v4531_v17, %v376_v41 }
  0xc1   :  { %489 = vmatmul.bf16.gmra.mxu1 %v3282_v10 }
  0xc6   :  { %v4520_v13 = vpop.f32.mrf.mxu1  ;;  %v378_v54 = vpop.f32.mrf.mxu0 }
  0xc7   :  { %v379_v61 = vadd.f32 %v4531_v17, %v378_v54 }
  0xce   :  { %v455_v22 = vpop.f32.mrf.mxu1  ;;  %v381_v63 = vpop.f32.mrf.mxu0 }
  0xcf   :  { %v456_v24 = vadd.f32 %v455_v22, %v367_v20  ;;  %v382_v9 = vadd.f32 %v4531_v17, %v381_v63 }
  0xd1   :  { %494 = vmatmul.bf16.gmra.mxu1 %v3290_v21  ;;  %v535_v32 = vmax.f32 %v456_v24, 0.0 }
  0xd6   :  { %v457_v26 = vpop.f32.mrf.mxu1  ;;  %v383_v20 = vpop.f32.mrf.mxu0 }
  0xd7   :  { %v458_v29 = vadd.f32 %v457_v26, %v369_v25  ;;  %v384_v21 = vadd.f32 %v4531_v17, %v383_v20  ;;  %v4103_v26 = vld [vmem:[%s5542_s0 + $0xc4] sm:$0xf] }
  0xd9   :  { %v536_v33 = vmax.f32 %v458_v29, 0.0  ;;  %v3322_v29 = vor.u32 %v4103_v26, %v3319_v27 }
  0xdb   :  { %v4554_v37 = vpack.c.bf16 %v536_v33, %v535_v32  ;;  %v3341_v32 = vld [vmem:[%s5542_s0 + $0xf0] sm:$0xf]  ;;  %v4110_v33 = vld [vmem:[%s5542_s0 + $0xf4] sm:$0xf0] }
  0xdc   :  { %v3342_v34 = vor.u32 %v4110_v33, %v3341_v32  ;;  %v409_v32 = vadd.f32 %v4531_v17, %v4510_v6  ;;  %v414_v6 = vadd.f32 %v4531_v17, %v4520_v13  ;;  %v416_v13 = vpop.f32.mrf.mxu2 }
  0xde   :  { %v460_v39 = vpop.f32.mrf.mxu1  ;;  %v386_v30 = vpop.f32.mrf.mxu0  ;;  %440 = vmatmul.bf16.gmra.mxu3 %v3342_v34 }
  0xdf   :  { %v461_v40 = vadd.f32 %v460_v39, %v372_v36  ;;  %v3327_v39 = vld [vmem:[%s5542_s0 + $0xd8] sm:$0xf0]  ;;  %v387_v16 = vadd.f32 %v4531_v17, %v386_v30 }
  0xe1   :  { %499 = vmatmul.bf16.gmra.mxu1 %v3298_v38  ;;  %v537_v48 = vmax.f32 %v461_v40, 0.0  ;;  %v4105_v38 = vld [vmem:[%s5542_s0 + $0xd4] sm:$0xf] }
  0xe2   :  { %v3330_v40 = vor.u32 %v4105_v38, %v3327_v39 }
  0xe6   :  { %v462_v43 = vpop.f32.mrf.mxu1  ;;  %v388_v36 = vpop.f32.mrf.mxu0 }
  0xe7   :  { %v463_v46 = vadd.f32 %v462_v43, %v374_v42  ;;  %v389_v0 = vadd.f32 %v4531_v17, %v388_v36 }
  0xe9   :  { %v538_v49 = vmax.f32 %v463_v46, 0.0 }
  0xeb   :  { %v4570_v53 = vpack.c.bf16 %v538_v49, %v537_v48 }
  0xee   :  { %v465_v56 = vpop.f32.mrf.mxu1  ;;  %v391_v42 = vpop.f32.mrf.mxu0 }
  0xef   :  { %v466_v59 = vadd.f32 %v465_v56, %v377_v52  ;;  %v3343_v52 = vld [vmem:[%s5542_s0 + $0xf8] sm:$0xf0] }
  0xf0   :  { %v3346_v54 = vor.u32 %v4109_v51, %v3343_v52  ;;  %v418_v51 = vpop.f32.mrf.mxu2 }
  0xf1   :  { %504 = vmatmul.bf16.gmra.mxu1 %v3306_v55  ;;  %v539_v3 = vmax.f32 %v466_v59, 0.0  ;;  %v404_v59 = vadd.f32 %v4531_v17, %v4500_v1  ;;  %v407_v1 = vadd.f32 %v4531_v17, %v4508_v5 }
  0xf6   :  { %v467_v62 = vpop.f32.mrf.mxu1  ;;  %v393_v46 = vpop.f32.mrf.mxu0 }
  0xf7   :  { %v468_v2 = vadd.f32 %v467_v62, %v379_v61  ;;  %v394_v63 = vadd.f32 %v4531_v17, %v393_v46 }
  0xf9   :  { %v540_v4 = vmax.f32 %v468_v2, 0.0 }
  0xfb   :  { %v4586_v10 = vpack.c.bf16 %v540_v4, %v539_v3  ;;  %v392_v4 = vadd.f32 %v4531_v17, %v391_v42 }
  0xfe   :  { %v470_v14 = vpop.f32.mrf.mxu1  ;;  %v396_v49 = vpop.f32.mrf.mxu0 }
  0xff   :  { %v471_v18 = vadd.f32 %v470_v14, %v382_v9  ;;  %v397_v60 = vadd.f32 %v4531_v17, %v396_v49 }
 0x101   :  { %509 = vmatmul.bf16.gmra.mxu1 %v3314_v12  ;;  %v541_v24 = vmax.f32 %v471_v18, 0.0 }
 0x106   :  { %v472_v22 = vpop.f32.mrf.mxu1  ;;  %v398_v56 = vpop.f32.mrf.mxu0 }
 0x107   :  { %v473_v23 = vadd.f32 %v472_v22, %v384_v21  ;;  %v399_v58 = vadd.f32 %v4531_v17, %v398_v56 }
 0x109   :  { %v542_v25 = vmax.f32 %v473_v23, 0.0 }
 0x10b   :  { %v4601_v28 = vpack.c.bf16 %v542_v25, %v541_v24 }
 0x10e   :  { %v475_v31 = vpop.f32.mrf.mxu1 }
 0x10f   :  { %v476_v25 = vadd.f32 %v475_v31, %v387_v16  ;;  %v412_v31 = vadd.f32 %v4531_v17, %v4518_v11 }
 0x111   :  { %514 = vmatmul.bf16.gmra.mxu1 %v3322_v29  ;;  %v543_v33 = vmax.f32 %v476_v25, 0.0 }
 0x116   :  { %v477_v35 = vpop.f32.mrf.mxu1 }
 0x117   :  { %v478_v21 = vadd.f32 %v477_v35, %v389_v0 }
 0x119   :  { %v544_v27 = vmax.f32 %v478_v21, 0.0 }
 0x11b   :  { %v571_v34 = vpack.c.bf16 %v544_v27, %v543_v33  ;;  %v4130_v33 = vld [vmem:[%s5543_s3 + $0x14] sm:$0xf0] }
 0x11e   :  { %v480_v41 = vpop.f32.mrf.mxu1 }
 0x11f   :  { %v481_v18 = vadd.f32 %v480_v41, %v392_v4 }
 0x121   :  { %519 = vmatmul.bf16.gmra.mxu1 %v3330_v40  ;;  %v545_v26 = vmax.f32 %v481_v18, 0.0 }
 0x126   :  { %v482_v43 = vpop.f32.mrf.mxu1 }
 0x127   :  { %v483_v12 = vadd.f32 %v482_v43, %v394_v63  ;;  %v3413_v63 = vld [vmem:[%s5543_s3] sm:$0xf] }
 0x129   :  { %v546_v22 = vmax.f32 %v483_v12, 0.0 }
 0x12b   :  { %v572_v29 = vpack.c.bf16 %v546_v22, %v545_v26 }
 0x12e   :  { %v485_v48 = vpop.f32.mrf.mxu1 }
 0x12f   :  { %v486_v7 = vadd.f32 %v485_v48, %v397_v60  ;;  %v431_v48 = vpop.f32.mrf.mxu3 }
 0x130   :  { %v432_v16 = vadd.f32 %v4531_v17, %v431_v48 }
 0x131   :  { %524 = vmatmul.bf16.gmra.mxu1 %v3338_v47  ;;  %v547_v19 = vmax.f32 %v486_v7, 0.0 }
 0x136   :  { %v487_v50 = vpop.f32.mrf.mxu1 }
 0x137   :  { %v488_v2 = vadd.f32 %v487_v50, %v399_v58 }
 0x139   :  { %v548_v14 = vmax.f32 %v488_v2, 0.0  ;;  %v4128_v2 = vld [vmem:[%s5543_s3 + $0x4] sm:$0xf0] }
 0x13a   :  { %v3414_v4 = vor.u32 %v4128_v2, %v3413_v63  ;;  %v4131_v2 = vld [vmem:[%s5543_s3 + $0x24] sm:$0xf] }
 0x13b   :  { %v573_v24 = vpack.c.bf16 %v548_v14, %v547_v19 }
 0x13e   :  { %v490_v55 = vpop.f32.mrf.mxu1 }
 0x13f   :  { %v491_v61 = vadd.f32 %v490_v55, %v402_v57  ;;  %v421_v55 = vpop.f32.mrf.mxu2 }
 0x141   :  { %529 = vmatmul.bf16.gmra.mxu1 %v3346_v54  ;;  %v549_v8 = vmax.f32 %v491_v61, 0.0 }
 0x146   :  { %v492_v62 = vpop.f32.mrf.mxu1 }
 0x147   :  { %v493_v3 = vadd.f32 %v492_v62, %v404_v59  ;;  %v423_v57 = vpop.f32.mrf.mxu2 }
 0x149   :  { %v550_v9 = vmax.f32 %v493_v3, 0.0 }
 0x14b   :  { %v574_v15 = vpack.c.bf16 %v550_v9, %v549_v8 }
 0x14d   :  { %1032 = vmatpush.bf16.msrb.mxu2 %v574_v15 }
 0x14e   :  { %v495_v20 = vpop.f32.mrf.mxu1 }
 0x14f   :  { %v496_v23 = vadd.f32 %v495_v20, %v407_v1  ;;  %v426_v60 = vpop.f32.mrf.mxu2 }
 0x150   :  { %v427_v26 = vadd.f32 %v4531_v17, %v426_v60  ;;  %v3423_v60 = vld [vmem:[%s5543_s3 + $0x18] sm:$0xf0] }
 0x151   :  { %1033 = vmatpush.bf16.msrb.mxu2 %v573_v24  ;;  %v551_v36 = vmax.f32 %v496_v23, 0.0 }
 0x155   :  { %1034 = vmatpush.bf16.msrb.mxu2 %v572_v29 }
 0x156   :  { %v497_v5 = vpop.f32.mrf.mxu1 }
 0x157   :  { %v498_v30 = vadd.f32 %v497_v5, %v409_v32  ;;  %v428_v1 = vpop.f32.mrf.mxu2  ;;  %v3421_v32 = vld [vmem:[%s5543_s3 + $0x10] sm:$0xf]  ;;  %v424_v5 = vadd.f32 %v4531_v17, %v423_v57 }
 0x158   :  { %v429_v22 = vadd.f32 %v4531_v17, %v428_v1  ;;  %v3437_v57 = vld [vmem:[%s5543_s3 + $0x30] sm:$0xf]  ;;  %v4140_v1 = vld [vmem:[%s5543_s3 + $0x64] sm:$0xf0] }
 0x159   :  { %v552_v38 = vmax.f32 %v498_v30, 0.0  ;;  %1035 = vmatpush.bf16.msrb.mxu2 %v571_v34 }
 0x15b   :  { %v4641_v35 = vpack.c.bf16 %v552_v38, %v551_v36  ;;  %v3422_v38 = vor.u32 %v4130_v33, %v3421_v32  ;;  %v4139_v33 = vld [vmem:[%s5543_s3 + $0x64] sm:$0xf] }
 0x15d   :  { %1036 = vmatpush.bf16.msrb.mxu2 %v4601_v28 }
 0x15e   :  { %v500_v39 = vpop.f32.mrf.mxu1 }
 0x15f   :  { %v501_v40 = vadd.f32 %v500_v39, %v412_v31  ;;  %v422_v31 = vadd.f32 %v4531_v17, %v421_v55 }
 0x161   :  { %1037 = vmatpush.bf16.msrb.mxu2 %v4586_v10  ;;  %v553_v43 = vmax.f32 %v501_v40, 0.0 }
 0x165   :  { %1038 = vmatpush.bf16.msrb.mxu2 %v4570_v53  ;;  %v433_v53 = vpop.f32.mrf.mxu3 }
 0x166   :  { %v502_v41 = vpop.f32.mrf.mxu1  ;;  %v434_v18 = vadd.f32 %v4531_v17, %v433_v53 }
 0x167   :  { %v503_v42 = vadd.f32 %v502_v41, %v414_v6  ;;  %v419_v6 = vadd.f32 %v4531_v17, %v418_v51 }
 0x169   :  { %v554_v44 = vmax.f32 %v503_v42, 0.0  ;;  %1039 = vmatpush.bf16.msrb.mxu2 %v4554_v37 }
 0x16b   :  { %v4651_v45 = vpack.c.bf16 %v554_v44, %v553_v43  ;;  %v417_v44 = vadd.f32 %v4531_v17, %v416_v13 }
 0x16c   :  { %1040 = vmatmul.bf16.vlgmr.msrb.gmra.mxu2 %v3414_v4 }
 0x16d   :  { %v436_v52 = vpop.f32.mrf.mxu3 }
 0x16e   :  { %v4653_v11 = vpop.f32.mrf.mxu1  ;;  %v437_v7 = vadd.f32 %v4531_v17, %v436_v52 }
 0x175   :  { %v438_v37 = vpop.f32.mrf.mxu3 }
 0x176   :  { %v4655_v28 = vpop.f32.mrf.mxu1  ;;  %v439_v8 = vadd.f32 %v4531_v17, %v438_v37  ;;  %v3415_v37 = vld [vmem:[%s5543_s3 + $0x8] sm:$0xf0] }
 0x17c   :  { %1045 = vmatmul.bf16.gmra.mxu2 %v3422_v38  ;;  %v3485_v38 = vld [vmem:[%s5543_s3 + $0x90] sm:$0xf] }
 0x17d   :  { %v441_v59 = vpop.f32.mrf.mxu3 }
 0x17e   :  { %v4657_v46 = vpop.f32.mrf.mxu1  ;;  %v442_v62 = vadd.f32 %v4531_v17, %v441_v59  ;;  %v4129_v59 = vld [vmem:[%s5543_s3 + $0x14] sm:$0xf] }
 0x17f   :  { %v511_v48 = vadd.f32 %v4657_v46, %v422_v31  ;;  %v4132_v46 = vld [vmem:[%s5543_s3 + $0x24] sm:$0xf0]  ;;  %v4146_v31 = vld [vmem:[%s5543_s3 + $0x94] sm:$0xf0] }
 0x185   :  { %v443_v3 = vpop.f32.mrf.mxu3 }
 0x186   :  { %v512_v10 = vpop.f32.mrf.mxu1  ;;  %v444_v9 = vadd.f32 %v4531_v17, %v443_v3  ;;  %v3429_v17 = vld [vmem:[%s5543_s3 + $0x20] sm:$0xf]  ;;  %v3431_v3 = vld [vmem:[%s5543_s3 + $0x28] sm:$0xf0] }
 0x187   :  { %v513_v41 = vadd.f32 %v512_v10, %v424_v5  ;;  %v3434_v4 = vor.u32 %v4131_v2, %v3431_v3  ;;  %v3463_v5 = vld [vmem:[%s5543_s3 + $0x68] sm:$0xf0] }
 0x18e   :  { %v515_v47 = vpop.f32.mrf.mxu1 }
 0x18f   :  { %v516_v39 = vadd.f32 %v515_v47, %v427_v26  ;;  %v506_v47 = vadd.f32 %v4653_v11, %v417_v44  ;;  %v4127_v11 = vld [vmem:[%s5543_s3 + $0x4] sm:$0xf] }
 0x190   :  { %v4191_v44 = vld [vmem:[%s5544_s4] sm:$0xff] }
 0x191   :  { %v559_v53 = vmax.f32 %v516_v39, 0.0  ;;  %v555_v10 = vmax.f32 %v506_v47, 0.0  ;;  %v3486_v39 = vor.u32 %v4146_v31, %v3485_v38  ;;  %v3479_v47 = vld [vmem:[%s5543_s3 + $0x88] sm:$0xf0] }
 0x196   :  { %v517_v49 = vpop.f32.mrf.mxu1 }
 0x197   :  { %v518_v30 = vadd.f32 %v517_v49, %v429_v22  ;;  %v508_v49 = vadd.f32 %v4655_v28, %v419_v6  ;;  %v3430_v28 = vor.u32 %v4132_v46, %v3429_v17  ;;  %v4142_v22 = vld [vmem:[%s5543_s3 + $0x74] sm:$0xf0]  ;;  %v3471_v6 = vld [vmem:[%s5543_s3 + $0x78] sm:$0xf0]  ;;  %v3501_v17 = vld [vmem:[%s5543_s3 + $0xb0] sm:$0xf] }
 0x198   :  { %v4150_v46 = vld [vmem:[%s5543_s3 + $0xb4] sm:$0xf0] }
 0x199   :  { %v560_v42 = vmax.f32 %v518_v30, 0.0  ;;  %v556_v55 = vmax.f32 %v508_v49, 0.0  ;;  %1050 = vmatmul.bf16.gmra.mxu2 %v3430_v28  ;;  %v4148_v49 = vld [vmem:[%s5543_s3 + $0xa4] sm:$0xf0] }
 0x19b   :  { %v579_v52 = vpack.c.bf16 %v560_v42, %v559_v53  ;;  %v577_v13 = vpack.c.bf16 %v556_v55, %v555_v10  ;;  %v4192_v42 = vld [vmem:[%s5544_s4 + $0x8] sm:$0xff]  ;;  %v3493_v53 = vld [vmem:[%s5543_s3 + $0xa0] sm:$0xf] }
 0x19c   :  { %1516 = vmatpush.bf16.msra.mxu1 %v4192_v42 }
 0x19e   :  { %v520_v50 = vpop.f32.mrf.mxu1 }
 0x19f   :  { %v521_v27 = vadd.f32 %v520_v50, %v432_v16  ;;  %v558_v50 = vmax.f32 %v513_v41, 0.0 }
 0x1a0   :  { %1517 = vmatpush.bf16.msra.mxu1 %v4191_v44 }
 0x1a1   :  { %v561_v40 = vmax.f32 %v521_v27, 0.0  ;;  %v3477_v27 = vld [vmem:[%s5543_s3 + $0x80] sm:$0xf] }
 0x1a6   :  { %v522_v54 = vpop.f32.mrf.mxu1 }
 0x1a7   :  { %v523_v23 = vadd.f32 %v522_v54, %v434_v18  ;;  %v557_v54 = vmax.f32 %v511_v48, 0.0  ;;  %v4135_v18 = vld [vmem:[%s5543_s3 + $0x44] sm:$0xf] }
 0x1a9   :  { %v562_v34 = vmax.f32 %v523_v23, 0.0  ;;  %v578_v51 = vpack.c.bf16 %v558_v50, %v557_v54  ;;  %v3494_v50 = vor.u32 %v4148_v49, %v3493_v53  ;;  %v3525_v53 = vld [vmem:[%s5543_s3 + $0xe0] sm:$0xf]  ;;  %v4156_v49 = vld [vmem:[%s5543_s3 + $0xe4] sm:$0xf0] }
 0x1ab   :  { %v580_v43 = vpack.c.bf16 %v562_v34, %v561_v40  ;;  %v3466_v34 = vor.u32 %v4139_v33, %v3463_v5  ;;  %v4141_v40 = vld [vmem:[%s5543_s3 + $0x74] sm:$0xf]  ;;  %v3503_v5 = vld [vmem:[%s5543_s3 + $0xb8] sm:$0xf0] }
 0x1ac   :  { %v4149_v33 = vld [vmem:[%s5543_s3 + $0xb4] sm:$0xf] }
 0x1ae   :  { %v525_v56 = vpop.f32.mrf.mxu1 }
 0x1af   :  { %v526_v19 = vadd.f32 %v525_v56, %v437_v7  ;;  %v3418_v56 = vor.u32 %v4127_v11, %v3415_v37  ;;  %v3453_v7 = vld [vmem:[%s5543_s3 + $0x50] sm:$0xf]  ;;  %v4145_v11 = vld [vmem:[%s5543_s3 + $0x94] sm:$0xf]  ;;  %v3487_v37 = vld [vmem:[%s5543_s3 + $0x98] sm:$0xf0] }
 0x1b1   :  { %v563_v29 = vmax.f32 %v526_v19, 0.0  ;;  %v3447_v19 = vld [vmem:[%s5543_s3 + $0x48] sm:$0xf0] }
 0x1b6   :  { %v527_v58 = vpop.f32.mrf.mxu1 }
 0x1b7   :  { %v528_v14 = vadd.f32 %v527_v58, %v439_v8  ;;  %v4138_v8 = vld [vmem:[%s5543_s3 + $0x54] sm:$0xf0] }
 0x1b9   :  { %v564_v24 = vmax.f32 %v528_v14, 0.0 }
 0x1bb   :  { %v581_v36 = vpack.c.bf16 %v564_v24, %v563_v29  ;;  %v4137_v24 = vld [vmem:[%s5543_s3 + $0x54] sm:$0xf]  ;;  %v4144_v29 = vld [vmem:[%s5543_s3 + $0x84] sm:$0xf0] }
 0x1bc   :  { %v3478_v32 = vor.u32 %v4144_v29, %v3477_v27  ;;  %v4154_v27 = vld [vmem:[%s5543_s3 + $0xd4] sm:$0xf0] }
 0x1be   :  { %v530_v61 = vpop.f32.mrf.mxu1 }
 0x1bf   :  { %v531_v0 = vadd.f32 %v530_v61, %v442_v62  ;;  %v3445_v61 = vld [vmem:[%s5543_s3 + $0x40] sm:$0xf]  ;;  %v4136_v62 = vld [vmem:[%s5543_s3 + $0x44] sm:$0xf0] }
 0x1c0   :  { %v3446_v63 = vor.u32 %v4136_v62, %v3445_v61  ;;  %v4193_v61 = vld [vmem:[%s5544_s4 + $0x10] sm:$0xff] }
 0x1c1   :  { %v565_v20 = vmax.f32 %v531_v0, 0.0  ;;  %v4133_v0 = vld [vmem:[%s5543_s3 + $0x34] sm:$0xf] }
 0x1c6   :  { %v532_v12 = vpop.f32.mrf.mxu1 }
 0x1c7   :  { %v533_v15 = vadd.f32 %v532_v12, %v444_v9  ;;  %v3454_v9 = vor.u32 %v4138_v8, %v3453_v7  ;;  %v3439_v12 = vld [vmem:[%s5543_s3 + $0x38] sm:$0xf0]  ;;  %v3509_v7 = vld [vmem:[%s5543_s3 + $0xc0] sm:$0xf]  ;;  %v4152_v8 = vld [vmem:[%s5543_s3 + $0xc4] sm:$0xf0] }
 0x1c8   :  { %v3442_v14 = vor.u32 %v4133_v0, %v3439_v12  ;;  %v4147_v12 = vld [vmem:[%s5543_s3 + $0xa4] sm:$0xf] }
 0x1c9   :  { %v566_v21 = vmax.f32 %v533_v15, 0.0  ;;  %v3461_v15 = vld [vmem:[%s5543_s3 + $0x60] sm:$0xf] }
 0x1ca   :  { %v3462_v16 = vor.u32 %v4140_v1, %v3461_v15 }
 0x1cb   :  { %v582_v25 = vpack.c.bf16 %v566_v21, %v565_v20  ;;  %v3450_v20 = vor.u32 %v4135_v18, %v3447_v19  ;;  %v3469_v21 = vld [vmem:[%s5543_s3 + $0x70] sm:$0xf] }
 0x1cc   :  { %v3470_v23 = vor.u32 %v4142_v22, %v3469_v21 }
 0x1cd   :  { %1201 = vmatpush.bf16.msrb.mxu3 %v582_v25  ;;  %v3455_v25 = vld [vmem:[%s5543_s3 + $0x58] sm:$0xf0] }
 0x1ce   :  { %v3458_v26 = vor.u32 %v4137_v24, %v3455_v25 }
 0x1d1   :  { %1202 = vmatpush.bf16.msrb.mxu3 %v581_v36 }
 0x1d5   :  { %1203 = vmatpush.bf16.msrb.mxu3 %v580_v43  ;;  %v3474_v43 = vor.u32 %v4141_v40, %v3471_v6  ;;  %v4195_v6 = vld [vmem:[%s5544_s4 + $0x20] sm:$0xff] }
 0x1d9   :  { %1204 = vmatpush.bf16.msrb.mxu3 %v579_v52  ;;  %v4143_v52 = vld [vmem:[%s5543_s3 + $0x84] sm:$0xf] }
 0x1da   :  { %v3482_v55 = vor.u32 %v4143_v52, %v3479_v47  ;;  %v4151_v47 = vld [vmem:[%s5543_s3 + $0xc4] sm:$0xf] }
 0x1dd   :  { %1205 = vmatpush.bf16.msrb.mxu3 %v578_v51 }
 0x1e1   :  { %1206 = vmatpush.bf16.msrb.mxu3 %v577_v13  ;;  %v3502_v13 = vor.u32 %v4150_v46, %v3501_v17 }
 0x1e5   :  { %1207 = vmatpush.bf16.msrb.mxu3 %v4651_v45  ;;  %v4134_v45 = vld [vmem:[%s5543_s3 + $0x34] sm:$0xf0] }
 0x1e6   :  { %v3438_v58 = vor.u32 %v4134_v45, %v3437_v57  ;;  %v4194_v45 = vld [vmem:[%s5544_s4 + $0x18] sm:$0xff] }
 0x1e7   :  { %1469 = vmatpush.bf16.msrb.mxu0 %v4194_v45  ;;  %v3533_v45 = vld [vmem:[%s5543_s3 + $0xf0] sm:$0xf] }
 0x1e8   :  { %1055 = vmatmul.bf16.gmra.mxu2 %v3438_v58 }
 0x1e9   :  { %1208 = vmatpush.bf16.msrb.mxu3 %v4641_v35  ;;  %v3426_v35 = vor.u32 %v4129_v59, %v3423_v60  ;;  %v3490_v60 = vor.u32 %v4145_v11, %v3487_v37 }
 0x1eb   :  { %1470 = vmatpush.bf16.msrb.mxu0 %v4193_v61  ;;  %v3519_v61 = vld [vmem:[%s5543_s3 + $0xd8] sm:$0xf0] }
 0x1ec   :  { %1209 = vmatmul.bf16.vlgmr.msrb.gmra.mxu3 %v3418_v56 }
 0x1ef   :  { %v1041_v30 = vpop.f32.mrf.mxu2 }
 0x1f7   :  { %v1043_v36 = vpop.f32.mrf.mxu2 }
 0x1f8   :  { %1060 = vmatmul.bf16.gmra.mxu2 %v3446_v63 }
 0x1fc   :  { %1214 = vmatmul.bf16.gmra.mxu3 %v3426_v35 }
 0x1ff   :  { %v1046_v41 = vpop.f32.mrf.mxu2 }
 0x207   :  { %v1048_v48 = vpop.f32.mrf.mxu2 }
 0x208   :  { %1065 = vmatmul.bf16.gmra.mxu2 %v3454_v9  ;;  %v3510_v9 = vor.u32 %v4152_v8, %v3509_v7 }
 0x20c   :  { %1219 = vmatmul.bf16.gmra.mxu3 %v3434_v4 }
 0x218   :  { %1070 = vmatmul.bf16.gmra.mxu2 %v3462_v16 }
 0x21c   :  { %1224 = vmatmul.bf16.gmra.mxu3 %v3442_v14  ;;  %v1051_v54 = vpop.f32.mrf.mxu2  ;;  %v3495_v14 = vld [vmem:[%s5543_s3 + $0xa8] sm:$0xf0] }
 0x21d   :  { %v3498_v19 = vor.u32 %v4147_v12, %v3495_v14 }
 0x224   :  { %v1053_v10 = vpop.f32.mrf.mxu2 }
 0x228   :  { %1075 = vmatmul.bf16.gmra.mxu2 %v3470_v23 }
 0x22c   :  { %1229 = vmatmul.bf16.gmra.mxu3 %v3450_v20 }
 0x238   :  { %1080 = vmatmul.bf16.gmra.mxu2 %v3478_v32 }
 0x23c   :  { %1234 = vmatmul.bf16.gmra.mxu3 %v3458_v26  ;;  %v3517_v26 = vld [vmem:[%s5543_s3 + $0xd0] sm:$0xf] }
 0x23d   :  { %v3518_v29 = vor.u32 %v4154_v27, %v3517_v26 }
 0x248   :  { %1085 = vmatmul.bf16.gmra.mxu2 %v3486_v39  ;;  %v3506_v39 = vor.u32 %v4149_v33, %v3503_v5 }
 0x24c   :  { %1239 = vmatmul.bf16.gmra.mxu3 %v3466_v34 }
 0x258   :  { %1090 = vmatmul.bf16.gmra.mxu2 %v3494_v50  ;;  %v3526_v50 = vor.u32 %v4156_v49, %v3525_v53 }
 0x25c   :  { %1244 = vmatmul.bf16.gmra.mxu3 %v3474_v43 }
 0x268   :  { %1095 = vmatmul.bf16.gmra.mxu2 %v3502_v13 }
 0x26b   :  { %v4814_v57 = vpop.f32.mrf.mxu2 }
 0x26c   :  { %1249 = vmatmul.bf16.gmra.mxu3 %v3482_v55 }
 0x26f   :  { %v1210_v51 = vpop.f32.mrf.mxu3 }
 0x270   :  { %v1211_v28 = vadd.f32 %v1210_v51, %v1041_v30 }
 0x272   :  { %v1370_v58 = vpack.c.bf16 %v1211_v28, %v1211_v28 }
 0x273   :  { %v1058_v4 = vpop.f32.mrf.mxu2 }
 0x274   :  { %v1486_v62 = vunpack.c.l.b16 %v1370_v58  ;;  %v4158_v58 = vld [vmem:[%s5543_s3 + $0xf4] sm:$0xf0] }
 0x277   :  { %v1212_v56 = vpop.f32.mrf.mxu3 }
 0x278   :  { %v1213_v59 = vadd.f32 %v1212_v56, %v1043_v36  ;;  %1100 = vmatmul.bf16.gmra.mxu2 %v3510_v9  ;;  %v4196_v36 = vld [vmem:[%s5544_s4 + $0x28] sm:$0xff]  ;;  %v4197_v9 = vld [vmem:[%s5544_s4 + $0x30] sm:$0xff] }
 0x279   :  { %1563 = vmatpush.bf16.msra.mxu0 %v4196_v36  ;;  %v3549_v36 = vld [vmem:[%s5543_s3 + $0x110] sm:$0xf] }
 0x27a   :  { %v1371_v35 = vpack.c.bf16 %v1213_v59, %v1213_v59  ;;  %v3534_v59 = vor.u32 %v4158_v58, %v3533_v45 }
 0x27b   :  { %v1061_v1 = vpop.f32.mrf.mxu2 }
 0x27c   :  { %v1487_v63 = vunpack.c.l.b16 %v1371_v35  ;;  %1254 = vmatmul.bf16.gmra.mxu3 %v3490_v60  ;;  %v4153_v35 = vld [vmem:[%s5543_s3 + $0xd4] sm:$0xf] }
 0x27d   :  { %1564 = vmatpush.bf16.msra.mxu0 %v4195_v6  ;;  %v3522_v7 = vor.u32 %v4153_v35, %v3519_v61  ;;  %v3535_v6 = vld [vmem:[%s5543_s3 + $0xf8] sm:$0xf0] }
 0x27e   :  { %v1490_v2 = vpack.c.b16 %v1487_v63, %v1486_v62 }
 0x27f   :  { %v1215_v3 = vpop.f32.mrf.mxu3 }
 0x280   :  { %3685 = vmatmul.msk.bf16.vlgmr.msra.gmra.mxu1 %vm1456_vm0, %v1490_v2  ;;  %v1216_v0 = vadd.f32 %v1215_v3, %v1046_v41  ;;  %v4198_v2 = vld [vmem:[%s5544_s4 + $0x38] sm:$0xff] }
 0x281   :  { %1614 = vmatpush.bf16.msrb.mxu1 %v4198_v2  ;;  %v3565_v2 = vld [vmem:[%s5543_s3 + $0x130] sm:$0xf] }
 0x282   :  { %v1372_v16 = vpack.c.bf16 %v1216_v0, %v1216_v0 }
 0x283   :  { %v1063_v25 = vpop.f32.mrf.mxu2 }
 0x284   :  { %v1488_v21 = vunpack.c.l.b16 %v1372_v16  ;;  %v3541_v16 = vld [vmem:[%s5543_s3 + $0x100] sm:$0xf] }
 0x285   :  { %1615 = vmatpush.bf16.msrb.mxu1 %v4197_v9  ;;  %v3551_v9 = vld [vmem:[%s5543_s3 + $0x118] sm:$0xf0] }
 0x287   :  { %v1217_v15 = vpop.f32.mrf.mxu3 }
 0x288   :  { %v1218_v18 = vadd.f32 %v1217_v15, %v1048_v48  ;;  %1105 = vmatmul.bf16.gmra.mxu2 %v3518_v29 }
 0x28a   :  { %v1373_v20 = vpack.c.bf16 %v1218_v18, %v1218_v18  ;;  %v4160_v18 = vld [vmem:[%s5543_s3 + $0x104] sm:$0xf0] }
 0x28b   :  { %v4848_v34 = vpop.f32.mrf.mxu2 }
 0x28c   :  { %v1489_v22 = vunpack.c.l.b16 %v1373_v20  ;;  %1259 = vmatmul.bf16.gmra.mxu3 %v3498_v19  ;;  %v3542_v19 = vor.u32 %v4160_v18, %v3541_v16 }
 0x28e   :  { %v1491_v23 = vpack.c.b16 %v1489_v22, %v1488_v21  ;;  %v4155_v21 = vld [vmem:[%s5543_s3 + $0xe4] sm:$0xf]  ;;  %v3527_v22 = vld [vmem:[%s5543_s3 + $0xe8] sm:$0xf0] }
 0x28f   :  { %v1220_v24 = vpop.f32.mrf.mxu3  ;;  %v3530_v27 = vor.u32 %v4155_v21, %v3527_v22 }
 0x290   :  { %3686 = vmatmul.msk.bf16.gmra.mxu1 %vm1456_vm0, %v1491_v23  ;;  %v1221_v32 = vadd.f32 %v1220_v24, %v1051_v54  ;;  %v3511_v54 = vld [vmem:[%s5543_s3 + $0xc8] sm:$0xf0] }
 0x291   :  { %v3514_v46 = vor.u32 %v4151_v47, %v3511_v54 }
 0x292   :  { %v1374_v38 = vpack.c.bf16 %v1221_v32, %v1221_v32 }
 0x293   :  { %v1068_v48 = vpop.f32.mrf.mxu2 }
 0x294   :  { %v1438_v41 = vunpack.c.l.b16 %v1374_v38  ;;  %v4162_v38 = vld [vmem:[%s5543_s3 + $0x114] sm:$0xf0] }
 0x297   :  { %v1222_v30 = vpop.f32.mrf.mxu3 }
 0x298   :  { %v1223_v31 = vadd.f32 %v1222_v30, %v1053_v10  ;;  %1110 = vmatmul.bf16.gmra.mxu2 %v3526_v50  ;;  %v4199_v50 = vld [vmem:[%s5544_s4 + $0x40] sm:$0xff] }
 0x29a   :  { %v1375_v40 = vpack.c.bf16 %v1223_v31, %v1223_v31  ;;  %v3550_v31 = vor.u32 %v4162_v38, %v3549_v36 }
 0x29b   :  { %v1071_v51 = vpop.f32.mrf.mxu2 }
 0x29c   :  { %v1439_v42 = vunpack.c.l.b16 %v1375_v40  ;;  %1264 = vmatmul.bf16.gmra.mxu3 %v3506_v39  ;;  %v4157_v40 = vld [vmem:[%s5543_s3 + $0xf4] sm:$0xf] }
 0x29d   :  { %v3538_v53 = vor.u32 %v4157_v40, %v3535_v6 }
 0x29e   :  { %v1442_v43 = vpack.c.b16 %v1439_v42, %v1438_v41 }
 0x29f   :  { %v1225_v44 = vpop.f32.mrf.mxu3 }
 0x2a0   :  { %3675 = vmatmul.msk.bf16.vlgmr.msrb.gmra.mxu0 %vm1456_vm0, %v1442_v43  ;;  %v1226_v52 = vadd.f32 %v1225_v44, %v4814_v57  ;;  %v4200_v43 = vld [vmem:[%s5544_s4 + $0x48] sm:$0xff] }
 0x2a1   :  { %1665 = vmatpush.bf16.msrb.mxu0 %v4200_v43  ;;  %v3581_v43 = vld [vmem:[%s5543_s3 + $0x150] sm:$0xf] }
 0x2a2   :  { %v1376_v10 = vpack.c.bf16 %v1226_v52, %v1226_v52 }
 0x2a3   :  { %v1073_v57 = vpop.f32.mrf.mxu2 }
 0x2a4   :  { %v1440_v28 = vunpack.c.l.b16 %v1376_v10  ;;  %v3557_v10 = vld [vmem:[%s5543_s3 + $0x120] sm:$0xf] }
 0x2a5   :  { %1666 = vmatpush.bf16.msrb.mxu0 %v4199_v50  ;;  %v3567_v50 = vld [vmem:[%s5543_s3 + $0x138] sm:$0xf0] }
 0x2a7   :  { %v1227_v55 = vpop.f32.mrf.mxu3 }
 0x2a8   :  { %v1228_v17 = vadd.f32 %v1227_v55, %v1058_v4  ;;  %1115 = vmatmul.bf16.gmra.mxu2 %v3534_v59 }
 0x2aa   :  { %v1377_v13 = vpack.c.bf16 %v1228_v17, %v1228_v17  ;;  %v4164_v17 = vld [vmem:[%s5543_s3 + $0x124] sm:$0xf0] }
 0x2ab   :  { %v4883_v63 = vpop.f32.mrf.mxu2 }
 0x2ac   :  { %v1441_v11 = vunpack.c.l.b16 %v1377_v13  ;;  %1269 = vmatmul.bf16.gmra.mxu3 %v3514_v46  ;;  %v3558_v46 = vor.u32 %v4164_v17, %v3557_v10 }
 0x2ae   :  { %v1443_v37 = vpack.c.b16 %v1441_v11, %v1440_v28  ;;  %v4159_v28 = vld [vmem:[%s5543_s3 + $0x104] sm:$0xf]  ;;  %v3543_v11 = vld [vmem:[%s5543_s3 + $0x108] sm:$0xf0] }
 0x2af   :  { %v1230_v56 = vpop.f32.mrf.mxu3  ;;  %v3546_v58 = vor.u32 %v4159_v28, %v3543_v11 }
 0x2b0   :  { %3676 = vmatmul.msk.bf16.gmra.mxu0 %vm1456_vm0, %v1443_v37  ;;  %v1231_v60 = vadd.f32 %v1230_v56, %v1061_v1 }
 0x2b2   :  { %v1378_v3 = vpack.c.bf16 %v1231_v60, %v1231_v60 }
 0x2b3   :  { %v1078_v1 = vpop.f32.mrf.mxu2 }
 0x2b4   :  { %v1533_v0 = vunpack.c.l.b16 %v1378_v3  ;;  %v4166_v3 = vld [vmem:[%s5543_s3 + $0x134] sm:$0xf0] }
 0x2b7   :  { %v1232_v62 = vpop.f32.mrf.mxu3 }
 0x2b8   :  { %v1233_v4 = vadd.f32 %v1232_v62, %v1063_v25  ;;  %1120 = vmatmul.bf16.gmra.mxu2 %v3542_v19  ;;  %v4201_v19 = vld [vmem:[%s5544_s4 + $0x50] sm:$0xff] }
 0x2ba   :  { %v1379_v8 = vpack.c.bf16 %v1233_v4, %v1233_v4  ;;  %v3566_v4 = vor.u32 %v4166_v3, %v3565_v2  ;;  %v4167_v2 = vld [vmem:[%s5543_s3 + $0x144] sm:$0xf]  ;;  %v3575_v3 = vld [vmem:[%s5543_s3 + $0x148] sm:$0xf0] }
 0x2bb   :  { %v1081_v24 = vpop.f32.mrf.mxu2 }
 0x2bc   :  { %v1534_v12 = vunpack.c.l.b16 %v1379_v8  ;;  %1274 = vmatmul.bf16.gmra.mxu3 %v3522_v7  ;;  %v4161_v8 = vld [vmem:[%s5543_s3 + $0x114] sm:$0xf] }
 0x2bd   :  { %v3554_v16 = vor.u32 %v4161_v8, %v3551_v9 }
 0x2be   :  { %v1537_v14 = vpack.c.b16 %v1534_v12, %v1533_v0 }
 0x2bf   :  { %v1235_v15 = vpop.f32.mrf.mxu3 }
 0x2c0   :  { %3695 = vmatmul.msk.bf16.vlgmr.msra.gmra.mxu0 %vm1456_vm0, %v1537_v14  ;;  %v1236_v20 = vadd.f32 %v1235_v15, %v4848_v34  ;;  %v4202_v14 = vld [vmem:[%s5544_s4 + $0x58] sm:$0xff] }
 0x2c1   :  { %1716 = vmatpush.bf16.msra.mxu1 %v4202_v14 }
 0x2c2   :  { %v1380_v25 = vpack.c.bf16 %v1236_v20, %v1236_v20 }
 0x2c3   :  { %v1083_v34 = vpop.f32.mrf.mxu2 }
 0x2c4   :  { %v1535_v32 = vunpack.c.l.b16 %v1380_v25  ;;  %v3573_v25 = vld [vmem:[%s5543_s3 + $0x140] sm:$0xf] }
 0x2c5   :  { %1717 = vmatpush.bf16.msra.mxu1 %v4201_v19 }
 0x2c7   :  { %v1237_v23 = vpop.f32.mrf.mxu3 }
 0x2c8   :  { %v1238_v26 = vadd.f32 %v1237_v23, %v1068_v48  ;;  %1125 = vmatmul.bf16.gmra.mxu2 %v3550_v31 }
 0x2ca   :  { %v1381_v29 = vpack.c.bf16 %v1238_v26, %v1238_v26  ;;  %v4168_v26 = vld [vmem:[%s5543_s3 + $0x144] sm:$0xf0] }
 0x2cb   :  { %v4918_v42 = vpop.f32.mrf.mxu2 }
 0x2cc   :  { %v1536_v33 = vunpack.c.l.b16 %v1381_v29  ;;  %1279 = vmatmul.bf16.gmra.mxu3 %v3530_v27  ;;  %v3574_v27 = vor.u32 %v4168_v26, %v3573_v25 }
 0x2ce   :  { %v1538_v5 = vpack.c.b16 %v1536_v33, %v1535_v32  ;;  %v4163_v32 = vld [vmem:[%s5543_s3 + $0x124] sm:$0xf]  ;;  %v3559_v33 = vld [vmem:[%s5543_s3 + $0x128] sm:$0xf0] }
 0x2cf   :  { %v1240_v30 = vpop.f32.mrf.mxu3  ;;  %v3562_v38 = vor.u32 %v4163_v32, %v3559_v33 }
 0x2d0   :  { %3696 = vmatmul.msk.bf16.gmra.mxu0 %vm1456_vm0, %v1538_v5  ;;  %v1241_v39 = vadd.f32 %v1240_v30, %v1071_v51 }
 0x2d2   :  { %v1382_v44 = vpack.c.bf16 %v1241_v39, %v1241_v39 }
 0x2d3   :  { %v1088_v51 = vpop.f32.mrf.mxu2 }
 0x2d4   :  { %v1584_v52 = vunpack.c.l.b16 %v1382_v44  ;;  %v4170_v44 = vld [vmem:[%s5543_s3 + $0x154] sm:$0xf0] }
 0x2d7   :  { %v1242_v41 = vpop.f32.mrf.mxu3 }
 0x2d8   :  { %v1243_v48 = vadd.f32 %v1242_v41, %v1073_v57  ;;  %1130 = vmatmul.bf16.gmra.mxu2 %v3558_v46 }
 0x2da   :  { %v1383_v49 = vpack.c.bf16 %v1243_v48, %v1243_v48  ;;  %v3582_v48 = vor.u32 %v4170_v44, %v3581_v43 }
 0x2db   :  { %v1091_v56 = vpop.f32.mrf.mxu2 }
 0x2dc   :  { %v1585_v47 = vunpack.c.l.b16 %v1383_v49  ;;  %1284 = vmatmul.bf16.gmra.mxu3 %v3538_v53  ;;  %v4165_v49 = vld [vmem:[%s5543_s3 + $0x134] sm:$0xf] }
 0x2dd   :  { %v3570_v10 = vor.u32 %v4165_v49, %v3567_v50 }
 0x2de   :  { %v1588_v54 = vpack.c.b16 %v1585_v47, %v1584_v52 }
 0x2df   :  { %v1245_v55 = vpop.f32.mrf.mxu3 }
 0x2e0   :  { %3705 = vmatmul.msk.bf16.vlgmr.msrb.gmra.mxu1 %vm1456_vm0, %v1588_v54  ;;  %v1246_v13 = vadd.f32 %v1245_v55, %v4883_v63  ;;  %v4204_v54 = vld [vmem:[%s5544_s4 + $0x68] sm:$0xff] }
 0x2e1   :  { %1767 = vmatpush.bf16.msra.mxu0 %v4204_v54  ;;  %v4171_v54 = vld [vmem:[%s5543_s3 + $0x164] sm:$0xf] }
 0x2e2   :  { %v1384_v57 = vpack.c.bf16 %v1246_v13, %v1246_v13  ;;  %v4203_v13 = vld [vmem:[%s5544_s4 + $0x60] sm:$0xff] }
 0x2e3   :  { %v1093_v63 = vpop.f32.mrf.mxu2 }
 0x2e4   :  { %v1586_v60 = vunpack.c.l.b16 %v1384_v57 }
 0x2e5   :  { %1768 = vmatpush.bf16.msra.mxu0 %v4203_v13 }
 0x2e7   :  { %v1247_v37 = vpop.f32.mrf.mxu3 }
 0x2e8   :  { %v1248_v45 = vadd.f32 %v1247_v37, %v1078_v1  ;;  %1135 = vmatmul.bf16.gmra.mxu2 %v3566_v4 }
 0x2ea   :  { %v1385_v59 = vpack.c.bf16 %v1248_v45, %v1248_v45 }
 0x2eb   :  { %v4953_v12 = vpop.f32.mrf.mxu2 }
 0x2ec   :  { %v1587_v35 = vunpack.c.l.b16 %v1385_v59  ;;  %1289 = vmatmul.bf16.gmra.mxu3 %v3546_v58  ;;  %v3589_v59 = vld [vmem:[%s5543_s3 + $0x160] sm:$0xf] }
 0x2ee   :  { %v1589_v61 = vpack.c.b16 %v1587_v35, %v1586_v60  ;;  %v4172_v60 = vld [vmem:[%s5543_s3 + $0x164] sm:$0xf0] }
 0x2ef   :  { %v1250_v62 = vpop.f32.mrf.mxu3  ;;  %v3590_v35 = vor.u32 %v4172_v60, %v3589_v59  ;;  %v3613_v60 = vld [vmem:[%s5543_s3 + $0x190] sm:$0xf] }
 0x2f0   :  { %3706 = vmatmul.msk.bf16.gmra.mxu1 %vm1456_vm0, %v1589_v61  ;;  %v1251_v7 = vadd.f32 %v1250_v62, %v1081_v24 }
 0x2f2   :  { %v1386_v15 = vpack.c.bf16 %v1251_v7, %v1251_v7 }
 0x2f3   :  { %v1098_v24 = vpop.f32.mrf.mxu2 }
 0x2f4   :  { %v1635_v20 = vunpack.c.l.b16 %v1386_v15 }
 0x2f7   :  { %v1252_v0 = vpop.f32.mrf.mxu3 }
 0x2f8   :  { %v1253_v1 = vadd.f32 %v1252_v0, %v1083_v34  ;;  %1140 = vmatmul.bf16.gmra.mxu2 %v3574_v27  ;;  %v3578_v0 = vor.u32 %v4167_v2, %v3575_v3  ;;  %v4169_v27 = vld [vmem:[%s5543_s3 + $0x154] sm:$0xf] }
 0x2f9   :  { %v4173_v3 = vld [vmem:[%s5543_s3 + $0x174] sm:$0xf] }
 0x2fa   :  { %v1387_v18 = vpack.c.bf16 %v1253_v1, %v1253_v1 }
 0x2fb   :  { %v4975_v30 = vpop.f32.mrf.mxu2 }
 0x2fc   :  { %v1636_v21 = vunpack.c.l.b16 %v1387_v18  ;;  %1294 = vmatmul.bf16.gmra.mxu3 %v3554_v16 }
 0x2fd   :  { %v1519_v17 = vpop.f32.mrf.mxu1 }
 0x2fe   :  { %v1639_v22 = vpack.c.b16 %v1636_v21, %v1635_v20 }
 0x2ff   :  { %v1255_v23 = vpop.f32.mrf.mxu3 }
 0x300   :  { %3715 = vmatmul.msk.bf16.vlgmr.msrb.gmra.mxu0 %vm1456_vm0, %v1639_v22  ;;  %v1256_v29 = vadd.f32 %v1255_v23, %v4918_v42  ;;  %v3597_v22 = vld [vmem:[%s5543_s3 + $0x170] sm:$0xf]  ;;  %v4174_v23 = vld [vmem:[%s5543_s3 + $0x174] sm:$0xf0] }
 0x302   :  { %v1388_v34 = vpack.c.bf16 %v1256_v29, %v1256_v29  ;;  %v3583_v29 = vld [vmem:[%s5543_s3 + $0x158] sm:$0xf0] }
 0x303   :  { %v4977_v42 = vpop.f32.mrf.mxu2 }
 0x304   :  { %v1637_v39 = vunpack.c.l.b16 %v1388_v34 }
 0x305   :  { %v5009_v61 = vpop.f32.mrf.mxu1 }
 0x307   :  { %v1257_v5 = vpop.f32.mrf.mxu3 }
 0x308   :  { %v1258_v36 = vadd.f32 %v1257_v5, %v1088_v51  ;;  %1145 = vmatmul.bf16.gmra.mxu2 %v3582_v48  ;;  %v4206_v5 = vld [vmem:[%s5544_s4 + $0x78] sm:$0xff] }
 0x309   :  { %1818 = vmatpush.bf16.msrb.mxu1 %v4206_v5  ;;  %v4175_v5 = vld [vmem:[%s5543_s3 + $0x184] sm:$0xf] }
 0x30a   :  { %v1389_v31 = vpack.c.bf16 %v1258_v36, %v1258_v36  ;;  %v3586_v36 = vor.u32 %v4169_v27, %v3583_v29 }
 0x30b   :  { %v4992_v47 = vpop.f32.mrf.mxu2 }
 0x30c   :  { %v1638_v40 = vunpack.c.l.b16 %v1389_v31  ;;  %1299 = vmatmul.bf16.gmra.mxu3 %v3562_v38  ;;  %v4205_v31 = vld [vmem:[%s5544_s4 + $0x70] sm:$0xff] }
 0x30d   :  { %v1524_v1 = vpop.f32.mrf.mxu1  ;;  %1819 = vmatpush.bf16.msrb.mxu1 %v4205_v31 }
 0x30e   :  { %v1640_v6 = vpack.c.b16 %v1638_v40, %v1637_v39 }
 0x30f   :  { %v1260_v41 = vpop.f32.mrf.mxu3 }
 0x310   :  { %3716 = vmatmul.msk.bf16.gmra.mxu0 %vm1456_vm0, %v1640_v6  ;;  %v1261_v53 = vadd.f32 %v1260_v41, %v1091_v56 }
 0x312   :  { %v1390_v55 = vpack.c.bf16 %v1261_v53, %v1261_v53  ;;  %v4176_v53 = vld [vmem:[%s5543_s3 + $0x184] sm:$0xf0] }
 0x313   :  { %v5000_v58 = vpop.f32.mrf.mxu2 }
 0x314   :  { %v1686_v28 = vunpack.c.l.b16 %v1390_v55  ;;  %v3591_v55 = vld [vmem:[%s5543_s3 + $0x168] sm:$0xf0] }
 0x315   :  { %v3594_v13 = vor.u32 %v4171_v54, %v3591_v55  ;;  %v5080_v2 = vpop.f32.mrf.mxu1 }
 0x317   :  { %v1262_v52 = vpop.f32.mrf.mxu3 }
 0x318   :  { %v1263_v51 = vadd.f32 %v1262_v52, %v1093_v63  ;;  %1150 = vmatmul.bf16.gmra.mxu2 %v3590_v35 }
 0x31a   :  { %v1391_v46 = vpack.c.bf16 %v1263_v51, %v1263_v51 }
 0x31b   :  { %v5020_v7 = vpop.f32.mrf.mxu2 }
 0x31c   :  { %v1687_v11 = vunpack.c.l.b16 %v1391_v46  ;;  %1304 = vmatmul.bf16.gmra.mxu3 %v3570_v10 }
 0x31d   :  { %v1472_v37 = vpop.f32.mrf.mxu0 }
 0x31e   :  { %v1690_v56 = vpack.c.b16 %v1687_v11, %v1686_v28  ;;  %v1520_v57 = vadd.f32 %v1519_v17, %v1472_v37 }
 0x31f   :  { %v1265_v45 = vpop.f32.mrf.mxu3 }
 0x320   :  { %3725 = vmatmul.msk.bf16.vlgmr.msra.gmra.mxu1 %vm1456_vm0, %v1690_v56  ;;  %v1266_v62 = vadd.f32 %v1265_v45, %v4953_v12 }
 0x322   :  { %v1392_v8 = vpack.c.bf16 %v1266_v62, %v1266_v62 }
 0x323   :  { %v5022_v21 = vpop.f32.mrf.mxu2 }
 0x324   :  { %v1688_v15 = vunpack.c.l.b16 %v1392_v8 }
 0x325   :  { %v5012_v63 = vpop.f32.mrf.mxu0 }
 0x327   :  { %v1267_v4 = vpop.f32.mrf.mxu3 }
 0x328   :  { %v1268_v9 = vadd.f32 %v1267_v4, %v1098_v24  ;;  %v3598_v24 = vor.u32 %v4174_v23, %v3597_v22  ;;  %v3599_v4 = vld [vmem:[%s5543_s3 + $0x178] sm:$0xf0] }
 0x32a   :  { %v1393_v14 = vpack.c.bf16 %v1268_v9, %v1268_v9  ;;  %1155 = vmatmul.bf16.gmra.mxu2 %v3598_v24 }
 0x32b   :  { %v5040_v33 = vpop.f32.mrf.mxu2 }
 0x32c   :  { %v1689_v12 = vunpack.c.l.b16 %v1393_v14  ;;  %1309 = vmatmul.bf16.gmra.mxu3 %v3578_v0  ;;  %v4208_v0 = vld [vmem:[%s5544_s4 + $0x88] sm:$0xff] }
 0x32d   :  { %v1477_v16 = vpop.f32.mrf.mxu0  ;;  %1869 = vmatpush.bf16.msrb.mxu0 %v4208_v0 }
 0x32e   :  { %v1691_v18 = vpack.c.b16 %v1689_v12, %v1688_v15  ;;  %v1525_v19 = vadd.f32 %v1524_v1, %v1477_v16  ;;  %v3602_v15 = vor.u32 %v4173_v3, %v3599_v4  ;;  %v4207_v1 = vld [vmem:[%s5544_s4 + $0x80] sm:$0xff]  ;;  %v4184_v4 = vld [vmem:[%s5543_s3 + $0x1c4] sm:$0xf0] }
 0x32f   :  { %v1270_v20 = vpop.f32.mrf.mxu3 }
 0x330   :  { %3726 = vmatmul.msk.bf16.gmra.mxu1 %vm1456_vm0, %v1691_v18  ;;  %v1271_v25 = vadd.f32 %v1270_v20, %v4975_v30 }
 0x331   :  { %1870 = vmatpush.bf16.msrb.mxu0 %v4207_v1 }
 0x332   :  { %v1394_v34 = vpack.c.bf16 %v1271_v25, %v1271_v25  ;;  %v4180_v25 = vld [vmem:[%s5543_s3 + $0x1a4] sm:$0xf0] }
 0x333   :  { %v5049_v48 = vpop.f32.mrf.mxu2 }
 0x334   :  { %v1737_v39 = vunpack.c.l.b16 %v1394_v34  ;;  %v3607_v34 = vld [vmem:[%s5543_s3 + $0x188] sm:$0xf0] }
 0x335   :  { %v5032_v26 = vpop.f32.mrf.mxu0 }
 0x337   :  { %v1272_v32 = vpop.f32.mrf.mxu3 }
 0x338   :  { %v1273_v30 = vadd.f32 %v1272_v32, %v4977_v42  ;;  %v3605_v42 = vld [vmem:[%s5543_s3 + $0x180] sm:$0xf] }
 0x339   :  { %v3606_v49 = vor.u32 %v4176_v53, %v3605_v42 }
 0x33a   :  { %v1395_v38 = vpack.c.bf16 %v1273_v30, %v1273_v30 }
 0x33b   :  { %1160 = vmatmul.bf16.gmra.mxu2 %v3606_v49  ;;  %v5067_v10 = vpop.f32.mrf.mxu2  ;;  %v3629_v49 = vld [vmem:[%s5543_s3 + $0x1b0] sm:$0xf] }
 0x33c   :  { %v1738_v40 = vunpack.c.l.b16 %v1395_v38  ;;  %1314 = vmatmul.bf16.gmra.mxu3 %v3586_v36 }
 0x33d   :  { %v1566_v6 = vpop.f32.mrf.mxu0 }
 0x33e   :  { %v1741_v41 = vpack.c.b16 %v1738_v40, %v1737_v39  ;;  %v1576_v43 = vadd.f32 %v1566_v6, %v1520_v57  ;;  %v3610_v39 = vor.u32 %v4175_v5, %v3607_v34  ;;  %v3645_v5 = vld [vmem:[%s5543_s3 + $0x1d0] sm:$0xf] }
 0x33f   :  { %v1275_v44 = vpop.f32.mrf.mxu3 }
 0x340   :  { %3735 = vmatmul.msk.bf16.vlgmr.msra.gmra.mxu0 %vm1456_vm0, %v1741_v41  ;;  %v1276_v50 = vadd.f32 %v1275_v44, %v4992_v47 }
 0x342   :  { %v1396_v17 = vpack.c.bf16 %v1276_v50, %v1276_v50 }
 0x343   :  { %v5070_v59 = vpop.f32.mrf.mxu2 }
 0x344   :  { %v1739_v47 = vunpack.c.l.b16 %v1396_v17  ;;  %v3615_v17 = vld [vmem:[%s5543_s3 + $0x198] sm:$0xf0] }
 0x345   :  { %v5059_v52 = vpop.f32.mrf.mxu0 }
 0x347   :  { %v1277_v51 = vpop.f32.mrf.mxu3 }
 0x348   :  { %v1278_v46 = vadd.f32 %v1277_v51, %v5000_v58  ;;  %v4178_v58 = vld [vmem:[%s5543_s3 + $0x194] sm:$0xf0]  ;;  %v4177_v51 = vld [vmem:[%s5543_s3 + $0x194] sm:$0xf] }
 0x349   :  { %v3614_v35 = vor.u32 %v4178_v58, %v3613_v60 }
 0x34a   :  { %v1397_v28 = vpack.c.bf16 %v1278_v46, %v1278_v46 }
 0x34b   :  { %1165 = vmatmul.bf16.gmra.mxu2 %v3614_v35  ;;  %v5088_v9 = vpop.f32.mrf.mxu2 }
 0x34c   :  { %v1740_v11 = vunpack.c.l.b16 %v1397_v28  ;;  %1319 = vmatmul.bf16.gmra.mxu3 %v3594_v13  ;;  %v4210_v28 = vld [vmem:[%s5544_s4 + $0x98] sm:$0xff] }
 0x34d   :  { %v1571_v37 = vpop.f32.mrf.mxu0  ;;  %1920 = vmatpush.bf16.msra.mxu1 %v4210_v28  ;;  %v4188_v28 = vld [vmem:[%s5543_s3 + $0x1e4] sm:$0xf0] }
 0x34e   :  { %v1742_v56 = vpack.c.b16 %v1740_v11, %v1739_v47  ;;  %v1578_v57 = vadd.f32 %v1571_v37, %v1525_v19  ;;  %v3618_v11 = vor.u32 %v4177_v51, %v3615_v17 }
 0x34f   :  { %v1280_v45 = vpop.f32.mrf.mxu3 }
 0x350   :  { %3736 = vmatmul.msk.bf16.gmra.mxu0 %vm1456_vm0, %v1742_v56  ;;  %v1281_v62 = vadd.f32 %v1280_v45, %v5020_v7  ;;  %v4209_v56 = vld [vmem:[%s5544_s4 + $0x90] sm:$0xff] }
 0x351   :  { %1921 = vmatpush.bf16.msra.mxu1 %v4209_v56  ;;  %v3639_v56 = vld [vmem:[%s5543_s3 + $0x1c8] sm:$0xf0] }
 0x352   :  { %v1398_v14 = vpack.c.bf16 %v1281_v62, %v1281_v62 }
 0x353   :  { %v5097_v24 = vpop.f32.mrf.mxu2 }
 0x354   :  { %v1788_v16 = vunpack.c.l.b16 %v1398_v14 }
 0x355   :  { %v5128_v55 = vpop.f32.mrf.mxu0 }
 0x357   :  { %v1282_v8 = vpop.f32.mrf.mxu3 }
 0x358   :  { %v1283_v7 = vadd.f32 %v1282_v8, %v5022_v21  ;;  %v3621_v21 = vld [vmem:[%s5543_s3 + $0x1a0] sm:$0xf] }
 0x359   :  { %v3622_v27 = vor.u32 %v4180_v25, %v3621_v21 }
 0x35a   :  { %v1399_v12 = vpack.c.bf16 %v1283_v7, %v1283_v7  ;;  %v4179_v7 = vld [vmem:[%s5543_s3 + $0x1a4] sm:$0xf] }
 0x35b   :  { %1170 = vmatmul.bf16.gmra.mxu2 %v3622_v27  ;;  %v5115_v36 = vpop.f32.mrf.mxu2 }
 0x35c   :  { %v1789_v18 = vunpack.c.l.b16 %v1399_v12  ;;  %1324 = vmatmul.bf16.gmra.mxu3 %v3602_v15  ;;  %v3623_v15 = vld [vmem:[%s5543_s3 + $0x1a8] sm:$0xf0] }
 0x35d   :  { %v1617_v19 = vpop.f32.mrf.mxu1 }
 0x35e   :  { %v1792_v20 = vpack.c.b16 %v1789_v18, %v1788_v16  ;;  %v1627_v22 = vadd.f32 %v1617_v19, %v1576_v43  ;;  %v3626_v19 = vor.u32 %v4179_v7, %v3623_v15  ;;  %v3661_v15 = vld [vmem:[%s5543_s3 + $0x1f0] sm:$0xf] }
 0x35f   :  { %v1285_v23 = vpop.f32.mrf.mxu3 }
 0x360   :  { %3745 = vmatmul.msk.bf16.vlgmr.msrb.gmra.mxu1 %vm1456_vm0, %v1792_v20  ;;  %v1286_v29 = vadd.f32 %v1285_v23, %v5040_v33 }
 0x362   :  { %v1400_v38 = vpack.c.bf16 %v1286_v29, %v1286_v29 }
 0x363   :  { %v5118_v53 = vpop.f32.mrf.mxu2 }
 0x364   :  { %v1790_v33 = vunpack.c.l.b16 %v1400_v38 }
 0x365   :  { %v5107_v32 = vpop.f32.mrf.mxu1 }
 0x367   :  { %v1287_v30 = vpop.f32.mrf.mxu3 }
 0x368   :  { %v1288_v31 = vadd.f32 %v1287_v30, %v5049_v48  ;;  %v4182_v48 = vld [vmem:[%s5543_s3 + $0x1b4] sm:$0xf0] }
 0x369   :  { %v3630_v50 = vor.u32 %v4182_v48, %v3629_v49 }
 0x36a   :  { %v1401_v40 = vpack.c.bf16 %v1288_v31, %v1288_v31  ;;  %v4181_v31 = vld [vmem:[%s5543_s3 + $0x1b4] sm:$0xf] }
 0x36b   :  { %1175 = vmatmul.bf16.gmra.mxu2 %v3630_v50  ;;  %v5136_v13 = vpop.f32.mrf.mxu2 }
 0x36c   :  { %v1791_v6 = vunpack.c.l.b16 %v1401_v40  ;;  %1329 = vmatmul.bf16.gmra.mxu3 %v3610_v39  ;;  %v3631_v39 = vld [vmem:[%s5543_s3 + $0x1b8] sm:$0xf0] }
 0x36d   :  { %v1622_v41 = vpop.f32.mrf.mxu1 }
 0x36e   :  { %v1793_v43 = vpack.c.b16 %v1791_v6, %v1790_v33  ;;  %v1629_v44 = vadd.f32 %v1622_v41, %v1578_v57  ;;  %v4212_v6 = vld [vmem:[%s5544_s4 + $0xa8] sm:$0xff] }
 0x36f   :  { %v1290_v42 = vpop.f32.mrf.mxu3  ;;  %1971 = vmatpush.bf16.msra.mxu0 %v4212_v6 }
 0x370   :  { %3746 = vmatmul.msk.bf16.gmra.mxu1 %vm1456_vm0, %v1793_v43  ;;  %v1291_v54 = vadd.f32 %v1290_v42, %v5067_v10  ;;  %v3634_v43 = vor.u32 %v4181_v31, %v3631_v39  ;;  %v4211_v42 = vld [vmem:[%s5544_s4 + $0xa0] sm:$0xff] }
 0x372   :  { %v1402_v47 = vpack.c.bf16 %v1291_v54, %v1291_v54 }
 0x373   :  { %v1138_v3 = vpop.f32.mrf.mxu2  ;;  %1972 = vmatpush.bf16.msra.mxu0 %v4211_v42 }
 0x374   :  { %v1839_v57 = vunpack.c.l.b16 %v1402_v47 }
 0x375   :  { %v5174_v38 = vpop.f32.mrf.mxu1 }
 0x377   :  { %v1292_v46 = vpop.f32.mrf.mxu3 }
 0x378   :  { %v1293_v10 = vadd.f32 %v1292_v46, %v5070_v59  ;;  %v3637_v59 = vld [vmem:[%s5543_s3 + $0x1c0] sm:$0xf] }
 0x379   :  { %v3638_v8 = vor.u32 %v4184_v4, %v3637_v59 }
 0x37a   :  { %v1403_v37 = vpack.c.bf16 %v1293_v10, %v1293_v10 }
 0x37b   :  { %1180 = vmatmul.bf16.gmra.mxu2 %v3638_v8  ;;  %v5161_v1 = vpop.f32.mrf.mxu2 }
 0x37c   :  { %v1840_v45 = vunpack.c.l.b16 %v1403_v37  ;;  %1334 = vmatmul.bf16.gmra.mxu3 %v3618_v11  ;;  %v4183_v37 = vld [vmem:[%s5543_s3 + $0x1c4] sm:$0xf] }
 0x37d   :  { %v1668_v60 = vpop.f32.mrf.mxu0 }
 0x37e   :  { %v1843_v58 = vpack.c.b16 %v1840_v45, %v1839_v57  ;;  %v1678_v35 = vadd.f32 %v1668_v60, %v1627_v22 }
 0x37f   :  { %v1295_v62 = vpop.f32.mrf.mxu3 }
 0x380   :  { %3755 = vmatmul.msk.bf16.vlgmr.msrb.gmra.mxu0 %vm1456_vm0, %v1843_v58  ;;  %v1296_v0 = vadd.f32 %v1295_v62, %v5088_v9  ;;  %v3642_v58 = vor.u32 %v4183_v37, %v3639_v56 }
 0x382   :  { %v1404_v16 = vpack.c.bf16 %v1296_v0, %v1296_v0 }
 0x383   :  { %v5164_v29 = vpop.f32.mrf.mxu2 }
 0x384   :  { %v1841_v9 = vunpack.c.l.b16 %v1404_v16 }
 0x385   :  { %v5153_v14 = vpop.f32.mrf.mxu0 }
 0x387   :  { %v1297_v12 = vpop.f32.mrf.mxu3 }
 0x388   :  { %v1298_v18 = vadd.f32 %v1297_v12, %v5097_v24  ;;  %v4186_v24 = vld [vmem:[%s5543_s3 + $0x1d4] sm:$0xf0] }
 0x389   :  { %v3646_v34 = vor.u32 %v4186_v24, %v3645_v5  ;;  %v4213_v5 = vld [vmem:[%s5544_s4 + $0xb0] sm:$0xff] }
 0x38a   :  { %v1405_v20 = vpack.c.bf16 %v1298_v18, %v1298_v18 }
 0x38b   :  { %1185 = vmatmul.bf16.gmra.mxu2 %v3646_v34  ;;  %v5182_v33 = vpop.f32.mrf.mxu2 }
 0x38c   :  { %v1842_v22 = vunpack.c.l.b16 %v1405_v20  ;;  %1339 = vmatmul.bf16.gmra.mxu3 %v3626_v19  ;;  %v4185_v20 = vld [vmem:[%s5543_s3 + $0x1d4] sm:$0xf] }
 0x38d   :  { %v1673_v23 = vpop.f32.mrf.mxu0 }
 0x38e   :  { %v1844_v21 = vpack.c.b16 %v1842_v22, %v1841_v9  ;;  %v1680_v25 = vadd.f32 %v1673_v23, %v1629_v44  ;;  %v3647_v9 = vld [vmem:[%s5543_s3 + $0x1d8] sm:$0xf0] }
 0x38f   :  { %v1300_v27 = vpop.f32.mrf.mxu3  ;;  %v4214_v23 = vld [vmem:[%s5544_s4 + $0xb8] sm:$0xff] }
 0x390   :  { %3756 = vmatmul.msk.bf16.gmra.mxu0 %vm1456_vm0, %v1844_v21  ;;  %v1301_v30 = vadd.f32 %v1300_v27, %v5115_v36  ;;  %2022 = vmatpush.bf16.msrb.mxu1 %v4214_v23 }
 0x392   :  { %v1406_v41 = vpack.c.bf16 %v1301_v30, %v1301_v30 }
 0x393   :  { %v1148_v46 = vpop.f32.mrf.mxu2 }
 0x394   :  { %v1890_v49 = vunpack.c.l.b16 %v1406_v41  ;;  %2023 = vmatpush.bf16.msrb.mxu1 %v4213_v5 }
 0x395   :  { %v5215_v19 = vpop.f32.mrf.mxu0 }
 0x397   :  { %v1302_v40 = vpop.f32.mrf.mxu3 }
 0x398   :  { %v1303_v36 = vadd.f32 %v1302_v40, %v5118_v53  ;;  %v3653_v53 = vld [vmem:[%s5543_s3 + $0x1e0] sm:$0xf] }
 0x399   :  { %v3654_v47 = vor.u32 %v4188_v28, %v3653_v53 }
 0x39a   :  { %v1407_v44 = vpack.c.bf16 %v1303_v36, %v1303_v36  ;;  %v4187_v36 = vld [vmem:[%s5543_s3 + $0x1e4] sm:$0xf] }
 0x39b   :  { %1190 = vmatmul.bf16.gmra.mxu2 %v3654_v47 }
 0x39c   :  { %v1891_v48 = vunpack.c.l.b16 %v1407_v44  ;;  %1344 = vmatmul.bf16.gmra.mxu3 %v3634_v43  ;;  %v3655_v43 = vld [vmem:[%s5543_s3 + $0x1e8] sm:$0xf0] }
 0x39d   :  { %v1719_v50 = vpop.f32.mrf.mxu1 }
 0x39e   :  { %v1894_v54 = vpack.c.b16 %v1891_v48, %v1890_v49  ;;  %v1729_v51 = vadd.f32 %v1719_v50, %v1678_v35  ;;  %v1151_v35 = vpop.f32.mrf.mxu2  ;;  %v3658_v50 = vor.u32 %v4187_v36, %v3655_v43 }
 0x39f   :  { %v1305_v17 = vpop.f32.mrf.mxu3 }
 0x3a0   :  { %3765 = vmatmul.msk.bf16.vlgmr.msra.gmra.mxu1 %vm1456_vm0, %v1894_v54  ;;  %v1306_v10 = vadd.f32 %v1305_v17, %v5136_v13 }
 0x3a2   :  { %v1408_v45 = vpack.c.bf16 %v1306_v10, %v1306_v10 }
 0x3a4   :  { %v1892_v59 = vunpack.c.l.b16 %v1408_v45 }
 0x3a5   :  { %v5199_v11 = vpop.f32.mrf.mxu1 }
 0x3a6   :  { %v1153_v16 = vpop.f32.mrf.mxu2 }
 0x3a7   :  { %v1307_v57 = vpop.f32.mrf.mxu3 }
 0x3a8   :  { %v1308_v60 = vadd.f32 %v1307_v57, %v1138_v3  ;;  %v4190_v3 = vld [vmem:[%s5543_s3 + $0x1f4] sm:$0xf0]  ;;  %v4189_v57 = vld [vmem:[%s5543_s3 + $0x1f4] sm:$0xf] }
 0x3a9   :  { %v3662_v12 = vor.u32 %v4190_v3, %v3661_v15 }
 0x3aa   :  { %v1409_v62 = vpack.c.bf16 %v1308_v60, %v1308_v60  ;;  %v4216_v60 = vld [vmem:[%s5544_s4 + $0xc8] sm:$0xff] }
 0x3ab   :  { %1195 = vmatmul.bf16.gmra.mxu2 %v3662_v12  ;;  %2073 = vmatpush.bf16.msrb.mxu0 %v4216_v60 }
 0x3ac   :  { %v1893_v4 = vunpack.c.l.b16 %v1409_v62  ;;  %1349 = vmatmul.bf16.gmra.mxu3 %v3642_v58 }
 0x3ad   :  { %v1724_v13 = vpop.f32.mrf.mxu1 }
 0x3ae   :  { %v1895_v8 = vpack.c.b16 %v1893_v4, %v1892_v59  ;;  %v1731_v0 = vadd.f32 %v1724_v13, %v1680_v25  ;;  %v1156_v31 = vpop.f32.mrf.mxu2  ;;  %v4215_v13 = vld [vmem:[%s5544_s4 + $0xc0] sm:$0xff] }
 0x3af   :  { %v1310_v7 = vpop.f32.mrf.mxu3  ;;  %2074 = vmatpush.bf16.msrb.mxu0 %v4215_v13 }
 0x3b0   :  { %3766 = vmatmul.msk.bf16.gmra.mxu1 %vm1456_vm0, %v1895_v8  ;;  %v1311_v18 = vadd.f32 %v1310_v7, %v5161_v1  ;;  %v3650_v1 = vor.u32 %v4185_v20, %v3647_v9 }
 0x3b2   :  { %v1410_v21 = vpack.c.bf16 %v1311_v18, %v1311_v18 }
 0x3b4   :  { %v1941_v24 = vunpack.c.l.b16 %v1410_v21 }
 0x3b5   :  { %v5241_v56 = vpop.f32.mrf.mxu1 }
 0x3b6   :  { %v1158_v42 = vpop.f32.mrf.mxu2 }
 0x3b7   :  { %v1312_v22 = vpop.f32.mrf.mxu3 }
 0x3b8   :  { %v1313_v25 = vadd.f32 %v1312_v22, %v5164_v29 }
 0x3ba   :  { %v1411_v27 = vpack.c.bf16 %v1313_v25, %v1313_v25 }
 0x3bc   :  { %v1942_v34 = vunpack.c.l.b16 %v1411_v27  ;;  %1354 = vmatmul.bf16.gmra.mxu3 %v3650_v1 }
 0x3bd   :  { %v1770_v30 = vpop.f32.mrf.mxu0 }
 0x3be   :  { %v1945_v39 = vpack.c.b16 %v1942_v34, %v1941_v24  ;;  %v1780_v40 = vadd.f32 %v1770_v30, %v1729_v51  ;;  %v1161_v10 = vpop.f32.mrf.mxu2 }
 0x3bf   :  { %v1315_v6 = vpop.f32.mrf.mxu3 }
 0x3c0   :  { %3775 = vmatmul.msk.bf16.vlgmr.msra.gmra.mxu0 %vm1456_vm0, %v1945_v39  ;;  %v1316_v29 = vadd.f32 %v1315_v6, %v5182_v33  ;;  %v4218_v6 = vld [vmem:[%s5544_s4 + $0xd8] sm:$0xff] }
 0x3c1   :  { %2124 = vmatpush.bf16.msra.mxu1 %v4218_v6 }
 0x3c2   :  { %v1412_v49 = vpack.c.bf16 %v1316_v29, %v1316_v29 }
 0x3c4   :  { %v1943_v51 = vunpack.c.l.b16 %v1412_v49 }
 0x3c5   :  { %v5232_v41 = vpop.f32.mrf.mxu0 }
 0x3c6   :  { %v1163_v4 = vpop.f32.mrf.mxu2 }
 0x3c7   :  { %v1317_v44 = vpop.f32.mrf.mxu3 }
 0x3c8   :  { %v1318_v48 = vadd.f32 %v1317_v44, %v1148_v46  ;;  %v3663_v46 = vld [vmem:[%s5543_s3 + $0x1f8] sm:$0xf0] }
 0x3c9   :  { %v3666_v59 = vor.u32 %v4189_v57, %v3663_v46 }
 0x3ca   :  { %v1413_v54 = vpack.c.bf16 %v1318_v48, %v1318_v48 }
 0x3cc   :  { %v1944_v17 = vunpack.c.l.b16 %v1413_v54  ;;  %1359 = vmatmul.bf16.gmra.mxu3 %v3658_v50 }
 0x3cd   :  { %v1775_v33 = vpop.f32.mrf.mxu0 }
 0x3ce   :  { %v1946_v53 = vpack.c.b16 %v1944_v17, %v1943_v51  ;;  %v1782_v28 = vadd.f32 %v1775_v33, %v1731_v0  ;;  %v1166_v20 = vpop.f32.mrf.mxu2 }
 0x3cf   :  { %v1320_v47 = vpop.f32.mrf.mxu3 }
 0x3d0   :  { %3776 = vmatmul.msk.bf16.gmra.mxu0 %vm1456_vm0, %v1946_v53  ;;  %v1321_v37 = vadd.f32 %v1320_v47, %v1151_v35 }
 0x3d2   :  { %v1414_v58 = vpack.c.bf16 %v1321_v37, %v1321_v37 }
 0x3d4   :  { %v1992_v8 = vunpack.c.l.b16 %v1414_v58 }
 0x3d6   :  { %v1168_v30 = vpop.f32.mrf.mxu2 }
 0x3d7   :  { %v1322_v45 = vpop.f32.mrf.mxu3 }
 0x3d8   :  { %v1323_v62 = vadd.f32 %v1322_v45, %v1153_v16 }
 0x3da   :  { %v1415_v35 = vpack.c.bf16 %v1323_v62, %v1323_v62 }
 0x3dc   :  { %v1993_v0 = vunpack.c.l.b16 %v1415_v35  ;;  %1364 = vmatmul.bf16.gmra.mxu3 %v3666_v59 }
 0x3dd   :  { %v1821_v7 = vpop.f32.mrf.mxu1 }
 0x3de   :  { %v1996_v15 = vpack.c.b16 %v1993_v0, %v1992_v8  ;;  %v1831_v3 = vadd.f32 %v1821_v7, %v1780_v40  ;;  %v5259_v40 = vpop.f32.mrf.mxu0  ;;  %v1171_v43 = vpop.f32.mrf.mxu2  ;;  %v4220_v7 = vld [vmem:[%s5544_s4 + $0xe8] sm:$0xff] }
 0x3df   :  { %v1325_v12 = vpop.f32.mrf.mxu3  ;;  %2175 = vmatpush.bf16.msra.mxu0 %v4220_v7 }
 0x3e0   :  { %3785 = vmatmul.msk.bf16.vlgmr.msrb.gmra.mxu1 %vm1456_vm0, %v1996_v15  ;;  %v1326_v18 = vadd.f32 %v1325_v12, %v1156_v31 }
 0x3e2   :  { %v1416_v22 = vpack.c.bf16 %v1326_v18, %v1326_v18  ;;  %v4219_v18 = vld [vmem:[%s5544_s4 + $0xe0] sm:$0xff] }
 0x3e3   :  { %2176 = vmatpush.bf16.msra.mxu0 %v4219_v18 }
 0x3e4   :  { %v1994_v25 = vunpack.c.l.b16 %v1416_v22 }
 0x3e5   :  { %v5256_v16 = vpop.f32.mrf.mxu1 }
 0x3e6   :  { %v1173_v33 = vpop.f32.mrf.mxu2 }
 0x3e7   :  { %v1327_v9 = vpop.f32.mrf.mxu3 }
 0x3e8   :  { %v1328_v23 = vadd.f32 %v1327_v9, %v1158_v42  ;;  %v4217_v42 = vld [vmem:[%s5544_s4 + $0xd0] sm:$0xff] }
 0x3e9   :  { %2125 = vmatpush.bf16.msra.mxu1 %v4217_v42 }
 0x3ea   :  { %v1417_v21 = vpack.c.bf16 %v1328_v23, %v1328_v23 }
 0x3ec   :  { %v1995_v1 = vunpack.c.l.b16 %v1417_v21 }
 0x3ed   :  { %v1826_v27 = vpop.f32.mrf.mxu1 }
 0x3ee   :  { %v1997_v5 = vpack.c.b16 %v1995_v1, %v1994_v25  ;;  %v1833_v24 = vadd.f32 %v1826_v27, %v1782_v28  ;;  %v1176_v58 = vpop.f32.mrf.mxu2 }
 0x3ef   :  { %v1330_v34 = vpop.f32.mrf.mxu3 }
 0x3f0   :  { %3786 = vmatmul.msk.bf16.gmra.mxu1 %vm1456_vm0, %v1997_v5  ;;  %v1331_v39 = vadd.f32 %v1330_v34, %v1161_v10 }
 0x3f2   :  { %v1418_v29 = vpack.c.bf16 %v1331_v39, %v1331_v39 }
 0x3f4   :  { %v2043_v49 = vunpack.c.l.b16 %v1418_v29 }
 0x3f5   :  { %v5271_v13 = vpop.f32.mrf.mxu1 }
 0x3f6   :  { %v1178_v0 = vpop.f32.mrf.mxu2 }
 0x3f7   :  { %v1332_v31 = vpop.f32.mrf.mxu3 }
 0x3f8   :  { %v1333_v36 = vadd.f32 %v1332_v31, %v1163_v4 }
 0x3fa   :  { %v1419_v44 = vpack.c.bf16 %v1333_v36, %v1333_v36 }
 0x3fc   :  { %v2044_v48 = vunpack.c.l.b16 %v1419_v44 }
 0x3fd   :  { %v1872_v50 = vpop.f32.mrf.mxu0 }
 0x3fe   :  { %v2047_v54 = vpack.c.b16 %v2044_v48, %v2043_v49  ;;  %v1882_v51 = vadd.f32 %v1872_v50, %v1831_v3  ;;  %v1181_v1 = vpop.f32.mrf.mxu2 }
 0x3ff   :  { %v1335_v17 = vpop.f32.mrf.mxu3 }
 0x400   :  { %3795 = vmatmul.msk.bf16.vlgmr.msrb.gmra.mxu0 %vm1456_vm0, %v2047_v54  ;;  %v1336_v53 = vadd.f32 %v1335_v17, %v1166_v20 }
 0x402   :  { %v1420_v10 = vpack.c.bf16 %v1336_v53, %v1336_v53 }
 0x404   :  { %v2045_v46 = vunpack.c.l.b16 %v1420_v10 }
 0x405   :  { %v5268_v28 = vpop.f32.mrf.mxu0 }
 0x406   :  { %v1183_v31 = vpop.f32.mrf.mxu2 }
 0x407   :  { %v1337_v47 = vpop.f32.mrf.mxu3 }
 0x408   :  { %v1338_v37 = vadd.f32 %v1337_v47, %v1168_v30  ;;  %v4221_v47 = vld [vmem:[%s5544_s4 + $0xf0] sm:$0xff] }
 0x40a   :  { %v1421_v57 = vpack.c.bf16 %v1338_v37, %v1338_v37 }
 0x40c   :  { %v2046_v45 = vunpack.c.l.b16 %v1421_v57 }
 0x40d   :  { %v1877_v60 = vpop.f32.mrf.mxu0 }
 0x40e   :  { %v2048_v62 = vpack.c.b16 %v2046_v45, %v2045_v46  ;;  %v1884_v59 = vadd.f32 %v1877_v60, %v1833_v24  ;;  %v1186_v50 = vpop.f32.mrf.mxu2 }
 0x40f   :  { %v1340_v35 = vpop.f32.mrf.mxu3 }
 0x410   :  { %3796 = vmatmul.msk.bf16.gmra.mxu0 %vm1456_vm0, %v2048_v62  ;;  %v1341_v4 = vadd.f32 %v1340_v35, %v1171_v43 }
 0x412   :  { %v1422_v15 = vpack.c.bf16 %v1341_v4, %v1341_v4 }
 0x414   :  { %v2094_v20 = vunpack.c.l.b16 %v1422_v15 }
 0x415   :  { %v5283_v48 = vpop.f32.mrf.mxu0 }
 0x416   :  { %v1188_v60 = vpop.f32.mrf.mxu2 }
 0x417   :  { %v1342_v8 = vpop.f32.mrf.mxu3 }
 0x418   :  { %v1343_v3 = vadd.f32 %v1342_v8, %v1173_v33 }
 0x41a   :  { %v1423_v12 = vpack.c.bf16 %v1343_v3, %v1343_v3 }
 0x41c   :  { %v2095_v9 = vunpack.c.l.b16 %v1423_v12 }
 0x41d   :  { %v1923_v22 = vpop.f32.mrf.mxu1 }
 0x41e   :  { %v2098_v23 = vpack.c.b16 %v2095_v9, %v2094_v20  ;;  %v1933_v21 = vadd.f32 %v1923_v22, %v1882_v51  ;;  %v4222_v51 = vld [vmem:[%s5544_s4 + $0xf8] sm:$0xff] }
 0x41f   :  { %v1345_v25 = vpop.f32.mrf.mxu3  ;;  %2226 = vmatpush.bf16.msrb.mxu1 %v4222_v51  ;;  %v4244_v9 = vld [vmem:[%s5545_s7 + $0x18] sm:$0xff] }
 0x420   :  { %3805 = vmatmul.msk.bf16.vlgmr.msra.gmra.mxu1 %vm1456_vm0, %v2098_v23  ;;  %v1346_v27 = vadd.f32 %v1345_v25, %v1176_v58  ;;  %v4252_v22 = vld [vmem:[%s5545_s7 + $0x58] sm:$0xff]  ;;  %2748 = vmatpush.bf16.msra.mxu2 %v4244_v9 }
 0x421   :  { %2807 = vmatpush.bf16.msra.mxu3 %v4252_v22 }
 0x422   :  { %v1424_v34 = vpack.c.bf16 %v1346_v27, %v1346_v27 }
 0x423   :  { %2227 = vmatpush.bf16.msrb.mxu1 %v4221_v47 }
 0x424   :  { %v2096_v6 = vunpack.c.l.b16 %v1424_v34 }
 0x425   :  { %v5280_v5 = vpop.f32.mrf.mxu1 }
 0x427   :  { %v1347_v24 = vpop.f32.mrf.mxu3 }
 0x428   :  { %v1348_v30 = vadd.f32 %v1347_v24, %v1178_v0  ;;  %v1191_v0 = vpop.f32.mrf.mxu2 }
 0x42a   :  { %v1425_v39 = vpack.c.bf16 %v1348_v30, %v1348_v30 }
 0x42c   :  { %v2097_v29 = vunpack.c.l.b16 %v1425_v39 }
 0x42d   :  { %v1928_v36 = vpop.f32.mrf.mxu1 }
 0x42e   :  { %v2099_v43 = vpack.c.b16 %v2097_v29, %v2096_v6  ;;  %v1935_v44 = vadd.f32 %v1928_v36, %v1884_v59 }
 0x42f   :  { %v1350_v42 = vpop.f32.mrf.mxu3 }
 0x430   :  { %3806 = vmatmul.msk.bf16.gmra.mxu1 %vm1456_vm0, %v2099_v43  ;;  %v1351_v49 = vadd.f32 %v1350_v42, %v1181_v1 }
 0x432   :  { %v1426_v17 = vpack.c.bf16 %v1351_v49, %v1351_v49 }
 0x434   :  { %v2145_v10 = vunpack.c.l.b16 %v1426_v17 }
 0x435   :  { %v5301_v1 = vpop.f32.mrf.mxu1 }
 0x437   :  { %v1352_v54 = vpop.f32.mrf.mxu3 }
 0x438   :  { %v1353_v33 = vadd.f32 %v1352_v54, %v1183_v31 }
 0x43a   :  { %v1427_v53 = vpack.c.bf16 %v1353_v33, %v1353_v33 }
 0x43c   :  { %v2146_v37 = vunpack.c.l.b16 %v1427_v53 }
 0x43d   :  { %v1974_v57 = vpop.f32.mrf.mxu0 }
 0x43e   :  { %v2149_v46 = vpack.c.b16 %v2146_v37, %v2145_v10  ;;  %v1984_v45 = vadd.f32 %v1974_v57, %v1933_v21  ;;  %v1193_v21 = vpop.f32.mrf.mxu2 }
 0x43f   :  { %v1355_v58 = vpop.f32.mrf.mxu3 }
 0x440   :  { %3815 = vmatmul.msk.bf16.vlgmr.msra.gmra.mxu0 %vm1456_vm0, %v2149_v46  ;;  %v1356_v62 = vadd.f32 %v1355_v58, %v1186_v50 }
 0x442   :  { %v1428_v4 = vpack.c.bf16 %v1356_v62, %v1356_v62 }
 0x444   :  { %v2147_v15 = vunpack.c.l.b16 %v1428_v4 }
 0x445   :  { %v5292_v59 = vpop.f32.mrf.mxu0 }
 0x446   :  { %v1196_v6 = vpop.f32.mrf.mxu2 }
 0x447   :  { %v1357_v35 = vpop.f32.mrf.mxu3 }
 0x448   :  { %v1358_v8 = vadd.f32 %v1357_v35, %v1188_v60 }
 0x44a   :  { %v1429_v7 = vpack.c.bf16 %v1358_v8, %v1358_v8  ;;  %v1522_v8 = vadd.f32 %v5009_v61, %v5012_v63 }
 0x44c   :  { %v2148_v3 = vunpack.c.l.b16 %v1429_v7  ;;  %v4251_v7 = vld [vmem:[%s5545_s7 + $0x50] sm:$0xff] }
 0x44d   :  { %v1979_v12 = vpop.f32.mrf.mxu0  ;;  %2808 = vmatpush.bf16.msra.mxu3 %v4251_v7  ;;  %v4227_v7 = vld [vmem:[%s5547_s6 + $0x20] sm:$0xff] }
 0x44e   :  { %v2150_v18 = vpack.c.b16 %v2148_v3, %v2147_v15  ;;  %v1986_v20 = vadd.f32 %v1979_v12, %v1935_v44  ;;  %v1198_v50 = vpop.f32.mrf.mxu2  ;;  %v1577_v12 = vadd.f32 %v5059_v52, %v1522_v8 }
 0x44f   :  { %v1360_v23 = vpop.f32.mrf.mxu3 }
 0x450   :  { %3816 = vmatmul.msk.bf16.gmra.mxu0 %vm1456_vm0, %v2150_v18  ;;  %v1361_v25 = vadd.f32 %v1360_v23, %v1191_v0  ;;  %v4243_v0 = vld [vmem:[%s5545_s7 + $0x10] sm:$0xff]  ;;  %v1628_v18 = vadd.f32 %v5107_v32, %v1577_v12  ;;  %v4228_v12 = vld [vmem:[%s5547_s6 + $0x28] sm:$0xff] }
 0x451   :  { %2749 = vmatpush.bf16.msra.mxu2 %v4243_v0 }
 0x452   :  { %v1430_v24 = vpack.c.bf16 %v1361_v25, %v1361_v25  ;;  %v1527_v25 = vadd.f32 %v5080_v2, %v5032_v26 }
 0x454   :  { %v2196_v39 = vunpack.c.l.b16 %v1430_v24 }
 0x455   :  { %v1981_v46 = vpop.f32.mrf.mxu0 }
 0x457   :  { %v1362_v27 = vpop.f32.mrf.mxu3 }
 0x458   :  { %v1363_v34 = vadd.f32 %v1362_v27, %v1193_v21  ;;  %v1579_v27 = vadd.f32 %v5128_v55, %v1527_v25  ;;  %v4302_v55 = vld [vmem:[%s5546_s5] ss:$0 sm:$0xff] }
 0x45a   :  { %v1431_v30 = vpack.c.bf16 %v1363_v34, %v1363_v34  ;;  %v1630_v34 = vadd.f32 %v5174_v38, %v1579_v27 }
 0x45c   :  { %v2197_v31 = vunpack.c.l.b16 %v1431_v30 }
 0x45d   :  { %v2025_v29 = vpop.f32.mrf.mxu1 }
 0x45e   :  { %v2200_v36 = vpack.c.b16 %v2197_v31, %v2196_v39  ;;  %v2035_v43 = vadd.f32 %v2025_v29, %v1984_v45 }
 0x45f   :  { %v1365_v44 = vpop.f32.mrf.mxu3 }
 0x460   :  { %3825 = vmatmul.msk.bf16.vlgmr.msrb.gmra.mxu1 %vm1456_vm0, %v2200_v36  ;;  %v1366_v42 = vadd.f32 %v1365_v44, %v1196_v6 }
 0x462   :  { %v1432_v51 = vpack.c.bf16 %v1366_v42, %v1366_v42 }
 0x464   :  { %v2198_v53 = vunpack.c.l.b16 %v1432_v51 }
 0x465   :  { %v2027_v49 = vpop.f32.mrf.mxu1 }
 0x467   :  { %v1367_v54 = vpop.f32.mrf.mxu3 }
 0x468   :  { %v1368_v17 = vadd.f32 %v1367_v54, %v1198_v50 }
 0x46a   :  { %v1433_v33 = vpack.c.bf16 %v1368_v17, %v1368_v17 }
 0x46c   :  { %v2199_v47 = vunpack.c.l.b16 %v1433_v33 }
 0x46d   :  { %v2030_v10 = vpop.f32.mrf.mxu1 }
 0x46e   :  { %v2201_v37 = vpack.c.b16 %v2199_v47, %v2198_v53  ;;  %v2037_v57 = vadd.f32 %v2030_v10, %v1986_v20  ;;  %v1679_v20 = vadd.f32 %v5153_v14, %v1628_v18  ;;  %v4229_v18 = vld [vmem:[%s5547_s6 + $0x30] sm:$0xff] }
 0x470   :  { %3826 = vmatmul.msk.bf16.gmra.mxu1 %vm1456_vm0, %v2201_v37  ;;  %v1730_v61 = vadd.f32 %v5199_v11, %v1679_v20  ;;  %v4241_v20 = vld [vmem:[%s5545_s7] sm:$0xff] }
 0x472   :  { %v1781_v9 = vadd.f32 %v5232_v41, %v1730_v61  ;;  %v4230_v61 = vld [vmem:[%s5547_s6 + $0x38] sm:$0xff] }
 0x474   :  { %v1832_v23 = vadd.f32 %v5256_v16, %v1781_v9  ;;  %v1681_v16 = vadd.f32 %v5215_v19, %v1630_v34  ;;  %v4231_v9 = vld [vmem:[%s5547_s6 + $0x40] sm:$0xff]  ;;  %v4232_v34 = vld [vmem:[%s5547_s6 + $0x48] sm:$0xff] }
 0x475   :  { %v2032_v45 = vpop.f32.mrf.mxu1 }
 0x476   :  { %v1883_v21 = vadd.f32 %v5268_v28, %v1832_v23  ;;  %v1732_v31 = vadd.f32 %v5241_v56, %v1681_v16  ;;  %v4247_v23 = vld [vmem:[%s5545_s7 + $0x30] sm:$0xff] }
 0x478   :  { %v1934_v52 = vadd.f32 %v5280_v5, %v1883_v21  ;;  %v1783_v5 = vadd.f32 %v5259_v40, %v1732_v31  ;;  %v4246_v21 = vld [vmem:[%s5545_s7 + $0x28] sm:$0xff] }
 0x47a   :  { %v1985_v32 = vadd.f32 %v5292_v59, %v1934_v52  ;;  %v1834_v38 = vadd.f32 %v5271_v13, %v1783_v5 }
 0x47c   :  { %v2036_v41 = vadd.f32 %v2027_v49, %v1985_v32  ;;  %v1885_v19 = vadd.f32 %v5283_v48, %v1834_v38  ;;  %v4245_v32 = vld [vmem:[%s5545_s7 + $0x20] sm:$0xff] }
 0x47d   :  { %v2076_v60 = vpop.f32.mrf.mxu0  ;;  %v4249_v38 = vld [vmem:[%s5545_s7 + $0x40] sm:$0xff] }
 0x47e   :  { %v2086_v14 = vadd.f32 %v2076_v60, %v2035_v43  ;;  %v1936_v56 = vadd.f32 %v5301_v1, %v1885_v19  ;;  %v4234_v19 = vld [vmem:[%s5547_s6 + $0x58] sm:$0xff] }
 0x480   :  { %v1987_v50 = vadd.f32 %v1981_v46, %v1936_v56  ;;  %v4224_v46 = vld [vmem:[%s5547_s6 + $0x8] sm:$0xff] }
 0x482   :  { %v2038_v33 = vadd.f32 %v2032_v45, %v1987_v50  ;;  %v4225_v45 = vld [vmem:[%s5547_s6 + $0x10] sm:$0xff] }
 0x485   :  { %v2078_v58 = vpop.f32.mrf.mxu0 }
 0x486   :  { %v2087_v39 = vadd.f32 %v2078_v58, %v2036_v41 }
 0x48d   :  { %v2081_v35 = vpop.f32.mrf.mxu0 }
 0x48e   :  { %v2088_v54 = vadd.f32 %v2081_v35, %v2037_v57  ;;  %v4223_v57 = vld [vmem:[%s5547_s6] sm:$0xff]  ;;  %v4226_v35 = vld [vmem:[%s5547_s6 + $0x18] sm:$0xff] }
 0x495   :  { %v2083_v15 = vpop.f32.mrf.mxu0 }
 0x496   :  { %v2089_v53 = vadd.f32 %v2083_v15, %v2038_v33  ;;  %v4242_v15 = vld [vmem:[%s5545_s7 + $0x8] sm:$0xff]  ;;  %v4235_v33 = vld [vmem:[%s5547_s6 + $0x60] sm:$0xff] }
 0x497   :  { %2750 = vmatpush.bf16.msra.mxu2 %v4242_v15  ;;  %v4237_v15 = vld [vmem:[%s5547_s6 + $0x70] sm:$0xff] }
 0x49b   :  { %2751 = vmatpush.bf16.msra.mxu2 %v4241_v20 }
 0x49d   :  { %v2127_v62 = vpop.f32.mrf.mxu1 }
 0x49e   :  { %v2137_v30 = vadd.f32 %v2127_v62, %v2086_v14 }
 0x4a5   :  { %v2129_v4 = vpop.f32.mrf.mxu1 }
 0x4a6   :  { %v2138_v26 = vadd.f32 %v2129_v4, %v2087_v39 }
 0x4ad   :  { %v2132_v3 = vpop.f32.mrf.mxu1 }
 0x4ae   :  { %v2139_v40 = vadd.f32 %v2132_v3, %v2088_v54  ;;  %v4250_v3 = vld [vmem:[%s5545_s7 + $0x48] sm:$0xff] }
 0x4af   :  { %2809 = vmatpush.bf16.msra.mxu3 %v4250_v3 }
 0x4b3   :  { %2810 = vmatpush.bf16.msra.mxu3 %v4249_v38  ;;  %v4240_v38 = vld [vmem:[%s5547_s6 + $0x88] sm:$0xff] }
 0x4b5   :  { %v2134_v22 = vpop.f32.mrf.mxu1 }
 0x4b6   :  { %v2140_v13 = vadd.f32 %v2134_v22, %v2089_v53  ;;  %v4255_v53 = vld [vmem:[%s5545_s7 + $0x70] sm:$0xff] }
 0x4bd   :  { %v2178_v63 = vpop.f32.mrf.mxu0 }
 0x4be   :  { %v2188_v28 = vadd.f32 %v2178_v63, %v2137_v30  ;;  %v4248_v63 = vld [vmem:[%s5545_s7 + $0x38] sm:$0xff] }
 0x4bf   :  { %2689 = vmatpush.bf16.msra.mxu1 %v4248_v63 }
 0x4c3   :  { %2690 = vmatpush.bf16.msra.mxu1 %v4247_v23 }
 0x4c5   :  { %v2180_v24 = vpop.f32.mrf.mxu0 }
 0x4c6   :  { %v2189_v59 = vadd.f32 %v2180_v24, %v2138_v26 }
 0x4c7   :  { %2691 = vmatpush.bf16.msra.mxu1 %v4246_v21 }
 0x4cb   :  { %2692 = vmatpush.bf16.msra.mxu1 %v4245_v32 }
 0x4cd   :  { %v2183_v43 = vpop.f32.mrf.mxu0 }
 0x4ce   :  { %v2190_v47 = vadd.f32 %v2183_v43, %v2139_v40 }
 0x4d5   :  { %v2185_v10 = vpop.f32.mrf.mxu0 }
 0x4d6   :  { %v2191_v60 = vadd.f32 %v2185_v10, %v2140_v13 }
 0x4dd   :  { %v2229_v11 = vpop.f32.mrf.mxu1 }
 0x4de   :  { %v2239_v2 = vadd.f32 %v2229_v11, %v2188_v28 }
 0x4e0   :  { %v2246_v29 = vadd.f32 %v4302_v55, %v2239_v2  ;;  %v4233_v2 = vld [vmem:[%s5547_s6 + $0x50] sm:$0xff] }
 0x4e2   :  { %v2250_v42 = vmax.f32 %v2246_v29, 0.0 }
 0x4e5   :  { %v2231_v6 = vpop.f32.mrf.mxu1 }
 0x4e6   :  { %v2240_v36 = vadd.f32 %v2231_v6, %v2189_v59 }
 0x4e8   :  { %v2247_v44 = vadd.f32 %v4302_v55, %v2240_v36 }
 0x4ea   :  { %v2251_v49 = vmax.f32 %v2247_v44, 0.0 }
 0x4ec   :  { %v2254_v51 = vpack.c.bf16 %v2251_v49, %v2250_v42 }
 0x4ed   :  { %v2234_v17 = vpop.f32.mrf.mxu1 }
 0x4ee   :  { %v2241_v37 = vadd.f32 %v2234_v17, %v2190_v47  ;;  %v4256_v17 = vld [vmem:[%s5545_s7 + $0x78] sm:$0xff]  ;;  %v4254_v47 = vld [vmem:[%s5545_s7 + $0x68] sm:$0xff] }
 0x4ef   :  { %2870 = vmatpush.bf16.msrb.mxu1 %v4256_v17 }
 0x4f0   :  { %v2248_v62 = vadd.f32 %v4302_v55, %v2241_v37 }
 0x4f2   :  { %v2252_v8 = vmax.f32 %v2248_v62, 0.0 }
 0x4f3   :  { %2871 = vmatpush.bf16.msrb.mxu1 %v4255_v53  ;;  %v4265_v53 = vld [vmem:[%s5545_s7 + $0xc0] sm:$0xff] }
 0x4f5   :  { %v2236_v58 = vpop.f32.mrf.mxu1 }
 0x4f6   :  { %v2242_v48 = vadd.f32 %v2236_v58, %v2191_v60  ;;  %v4253_v60 = vld [vmem:[%s5545_s7 + $0x60] sm:$0xff] }
 0x4f7   :  { %2872 = vmatpush.bf16.msrb.mxu1 %v4254_v47 }
 0x4f8   :  { %v2249_v4 = vadd.f32 %v4302_v55, %v2242_v48 }
 0x4fa   :  { %v2253_v1 = vmax.f32 %v2249_v4, 0.0  ;;  %v4236_v4 = vld [vmem:[%s5547_s6 + $0x68] sm:$0xff] }
 0x4fb   :  { %2873 = vmatpush.bf16.msrb.mxu1 %v4253_v60 }
 0x4fc   :  { %v2255_v0 = vpack.c.bf16 %v2253_v1, %v2252_v8 }
 0x4fe   :  { %2515 = vmatpush.bf16.msrb.mxu0 %v2255_v0 }
 0x502   :  { %2516 = vmatpush.bf16.msrb.mxu0 %v2254_v51 }
 0x505   :  { %3899 = vmatmul.msk.bf16.vlgmr.msrb.gmra.mxu0 %vm1456_vm0, %v4223_v57 }
 0x515   :  { %3900 = vmatmul.msk.bf16.gmra.mxu0 %vm1456_vm0, %v4224_v46 }
 0x525   :  { %3901 = vmatmul.msk.bf16.gmra.mxu0 %vm1456_vm0, %v4225_v45 }
 0x535   :  { %3902 = vmatmul.msk.bf16.gmra.mxu0 %vm1456_vm0, %v4226_v35 }
 0x545   :  { %3903 = vmatmul.msk.bf16.gmra.mxu0 %vm1456_vm0, %v4227_v7  ;;  %v4260_v7 = vld [vmem:[%s5545_s7 + $0x98] sm:$0xff] }
 0x546   :  { %2933 = vmatpush.bf16.msrb.mxu2 %v4260_v7 }
 0x555   :  { %3904 = vmatmul.msk.bf16.gmra.mxu0 %vm1456_vm0, %v4228_v12  ;;  %v4259_v12 = vld [vmem:[%s5545_s7 + $0x90] sm:$0xff] }
 0x556   :  { %2934 = vmatpush.bf16.msrb.mxu2 %v4259_v12 }
 0x565   :  { %3905 = vmatmul.msk.bf16.gmra.mxu0 %vm1456_vm0, %v4229_v18  ;;  %v4258_v18 = vld [vmem:[%s5545_s7 + $0x88] sm:$0xff] }
 0x566   :  { %2935 = vmatpush.bf16.msrb.mxu2 %v4258_v18 }
 0x575   :  { %3906 = vmatmul.msk.bf16.gmra.mxu0 %vm1456_vm0, %v4230_v61 }
 0x582   :  { %v2518_v22 = vpop.f32.mrf.mxu0 }
 0x583   :  { %v2608_v25 = vpack.c.bf16 %v2518_v22, %v2518_v22 }
 0x585   :  { %3907 = vmatmul.msk.bf16.gmra.mxu0 %vm1456_vm0, %v4231_v9  ;;  %v2708_v14 = vunpack.c.l.b16 %v2608_v25  ;;  %v4257_v9 = vld [vmem:[%s5545_s7 + $0x80] sm:$0xff]  ;;  %v4238_v25 = vld [vmem:[%s5547_s6 + $0x78] sm:$0xff] }
 0x586   :  { %2936 = vmatpush.bf16.msrb.mxu2 %v4257_v9 }
 0x58a   :  { %v2520_v52 = vpop.f32.mrf.mxu0 }
 0x58b   :  { %v2609_v27 = vpack.c.bf16 %v2520_v52, %v2520_v52 }
 0x58d   :  { %v2709_v24 = vunpack.c.l.b16 %v2609_v27 }
 0x58f   :  { %v2712_v11 = vpack.c.b16 %v2709_v24, %v2708_v14 }
 0x591   :  { %3951 = vmatmul.msk.bf16.vlgmr.msra.gmra.mxu2 %vm2678_vm1, %v2712_v11 }
 0x592   :  { %v2523_v41 = vpop.f32.mrf.mxu0 }
 0x593   :  { %v2610_v30 = vpack.c.bf16 %v2523_v41, %v2523_v41  ;;  %v4264_v41 = vld [vmem:[%s5545_s7 + $0xb8] sm:$0xff] }
 0x594   :  { %2996 = vmatpush.bf16.msrb.mxu3 %v4264_v41 }
 0x595   :  { %3908 = vmatmul.msk.bf16.gmra.mxu0 %vm1456_vm0, %v4232_v34  ;;  %v2710_v28 = vunpack.c.l.b16 %v2610_v30  ;;  %v4239_v30 = vld [vmem:[%s5547_s6 + $0x80] sm:$0xff] }
 0x59a   :  { %v2525_v16 = vpop.f32.mrf.mxu0 }
 0x59b   :  { %v2611_v39 = vpack.c.bf16 %v2525_v16, %v2525_v16 }
 0x59d   :  { %v2711_v31 = vunpack.c.l.b16 %v2611_v39  ;;  %v4263_v39 = vld [vmem:[%s5545_s7 + $0xb0] sm:$0xff] }
 0x59e   :  { %2997 = vmatpush.bf16.msrb.mxu3 %v4263_v39 }
 0x59f   :  { %v2713_v26 = vpack.c.b16 %v2711_v31, %v2710_v28  ;;  %v4262_v28 = vld [vmem:[%s5545_s7 + $0xa8] sm:$0xff] }
 0x5a1   :  { %3952 = vmatmul.msk.bf16.gmra.mxu2 %vm2678_vm1, %v2713_v26 }
 0x5a2   :  { %v2528_v55 = vpop.f32.mrf.mxu0  ;;  %2998 = vmatpush.bf16.msrb.mxu3 %v4262_v28 }
 0x5a3   :  { %v2612_v5 = vpack.c.bf16 %v2528_v55, %v2528_v55  ;;  %v4261_v55 = vld [vmem:[%s5545_s7 + $0xa0] sm:$0xff] }
 0x5a5   :  { %3909 = vmatmul.msk.bf16.gmra.mxu0 %vm1456_vm0, %v4233_v2  ;;  %v2648_v29 = vunpack.c.l.b16 %v2612_v5 }
 0x5a6   :  { %2999 = vmatpush.bf16.msrb.mxu3 %v4261_v55 }
 0x5aa   :  { %v2530_v59 = vpop.f32.mrf.mxu0 }
 0x5ab   :  { %v2613_v6 = vpack.c.bf16 %v2530_v59, %v2530_v59 }
 0x5ad   :  { %v2649_v36 = vunpack.c.l.b16 %v2613_v6 }
 0x5af   :  { %v2652_v43 = vpack.c.b16 %v2649_v36, %v2648_v29 }
 0x5b1   :  { %3933 = vmatmul.msk.bf16.vlgmr.msra.gmra.mxu1 %vm2678_vm1, %v2652_v43 }
 0x5b2   :  { %v2533_v44 = vpop.f32.mrf.mxu0 }
 0x5b3   :  { %v2614_v56 = vpack.c.bf16 %v2533_v44, %v2533_v44 }
 0x5b5   :  { %3910 = vmatmul.msk.bf16.gmra.mxu0 %vm1456_vm0, %v4234_v19  ;;  %v2650_v50 = vunpack.c.l.b16 %v2614_v56 }
 0x5ba   :  { %v2535_v42 = vpop.f32.mrf.mxu0 }
 0x5bb   :  { %v2615_v49 = vpack.c.bf16 %v2535_v42, %v2535_v42 }
 0x5bd   :  { %v2651_v54 = vunpack.c.l.b16 %v2615_v49  ;;  %v4268_v49 = vld [vmem:[%s5545_s7 + $0xd8] sm:$0xff] }
 0x5be   :  { %3059 = vmatpush.bf16.msra.mxu1 %v4268_v49 }
 0x5bf   :  { %v2653_v51 = vpack.c.b16 %v2651_v54, %v2650_v50  ;;  %v4267_v54 = vld [vmem:[%s5545_s7 + $0xd0] sm:$0xff] }
 0x5c1   :  { %3934 = vmatmul.msk.bf16.gmra.mxu1 %vm2678_vm1, %v2653_v51  ;;  %v4266_v51 = vld [vmem:[%s5545_s7 + $0xc8] sm:$0xff] }
 0x5c2   :  { %v2538_v40 = vpop.f32.mrf.mxu0  ;;  %3060 = vmatpush.bf16.msra.mxu1 %v4267_v54 }
 0x5c3   :  { %v2616_v10 = vpack.c.bf16 %v2538_v40, %v2538_v40 }
 0x5c5   :  { %3911 = vmatmul.msk.bf16.gmra.mxu0 %vm1456_vm0, %v4235_v33  ;;  %v2767_v58 = vunpack.c.l.b16 %v2616_v10 }
 0x5c6   :  { %3061 = vmatpush.bf16.msra.mxu1 %v4266_v51 }
 0x5ca   :  { %v2540_v13 = vpop.f32.mrf.mxu0  ;;  %3062 = vmatpush.bf16.msra.mxu1 %v4265_v53 }
 0x5cb   :  { %v2617_v37 = vpack.c.bf16 %v2540_v13, %v2540_v13 }
 0x5cd   :  { %v2768_v62 = vunpack.c.l.b16 %v2617_v37 }
 0x5cf   :  { %v2771_v48 = vpack.c.b16 %v2768_v62, %v2767_v58 }
 0x5d1   :  { %3969 = vmatmul.msk.bf16.vlgmr.msra.gmra.mxu3 %vm2678_vm1, %v2771_v48 }
 0x5d2   :  { %v2543_v8 = vpop.f32.mrf.mxu0 }
 0x5d3   :  { %v2618_v1 = vpack.c.bf16 %v2543_v8, %v2543_v8 }
 0x5d5   :  { %3912 = vmatmul.msk.bf16.gmra.mxu0 %vm1456_vm0, %v4236_v4  ;;  %v2769_v46 = vunpack.c.l.b16 %v2618_v1  ;;  %v4272_v1 = vld [vmem:[%s5545_s7 + $0xf8] sm:$0xff] }
 0x5d6   :  { %3122 = vmatpush.bf16.msra.mxu2 %v4272_v1 }
 0x5da   :  { %v2545_v0 = vpop.f32.mrf.mxu0 }
 0x5db   :  { %v2619_v57 = vpack.c.bf16 %v2545_v0, %v2545_v0 }
 0x5dd   :  { %v2770_v45 = vunpack.c.l.b16 %v2619_v57  ;;  %v4271_v57 = vld [vmem:[%s5545_s7 + $0xf0] sm:$0xff] }
 0x5de   :  { %3123 = vmatpush.bf16.msra.mxu2 %v4271_v57 }
 0x5df   :  { %v2772_v35 = vpack.c.b16 %v2770_v45, %v2769_v46  ;;  %v4270_v46 = vld [vmem:[%s5545_s7 + $0xe8] sm:$0xff] }
 0x5e1   :  { %3970 = vmatmul.msk.bf16.gmra.mxu3 %vm2678_vm1, %v2772_v35 }
 0x5e2   :  { %v2548_v3 = vpop.f32.mrf.mxu0  ;;  %3124 = vmatpush.bf16.msra.mxu2 %v4270_v46 }
 0x5e3   :  { %v2620_v20 = vpack.c.bf16 %v2548_v3, %v2548_v3 }
 0x5e5   :  { %3913 = vmatmul.msk.bf16.gmra.mxu0 %vm1456_vm0, %v4237_v15  ;;  %v2830_v22 = vunpack.c.l.b16 %v2620_v20  ;;  %v4269_v15 = vld [vmem:[%s5545_s7 + $0xe0] sm:$0xff] }
 0x5e6   :  { %3125 = vmatpush.bf16.msra.mxu2 %v4269_v15 }
 0x5ea   :  { %v2550_v61 = vpop.f32.mrf.mxu0 }
 0x5eb   :  { %v2621_v63 = vpack.c.bf16 %v2550_v61, %v2550_v61 }
 0x5ed   :  { %v2831_v23 = vunpack.c.l.b16 %v2621_v63 }
 0x5ef   :  { %v2834_v21 = vpack.c.b16 %v2831_v23, %v2830_v22 }
 0x5f1   :  { %3987 = vmatmul.msk.bf16.vlgmr.msrb.gmra.mxu1 %vm2678_vm1, %v2834_v21 }
 0x5f2   :  { %v2553_v52 = vpop.f32.mrf.mxu0 }
 0x5f3   :  { %v2622_v27 = vpack.c.bf16 %v2553_v52, %v2553_v52 }
 0x5f5   :  { %3914 = vmatmul.msk.bf16.gmra.mxu0 %vm1456_vm0, %v4238_v25  ;;  %v2832_v24 = vunpack.c.l.b16 %v2622_v27  ;;  %v4276_v25 = vld [vmem:[%s5545_s7 + $0x118] sm:$0xff]  ;;  %v4275_v27 = vld [vmem:[%s5545_s7 + $0x110] sm:$0xff] }
 0x5f6   :  { %3185 = vmatpush.bf16.msra.mxu3 %v4276_v25 }
 0x5fa   :  { %v2555_v32 = vpop.f32.mrf.mxu0  ;;  %3186 = vmatpush.bf16.msra.mxu3 %v4275_v27 }
 0x5fb   :  { %v2623_v14 = vpack.c.bf16 %v2555_v32, %v2555_v32  ;;  %v4274_v32 = vld [vmem:[%s5545_s7 + $0x108] sm:$0xff] }
 0x5fd   :  { %v2833_v11 = vunpack.c.l.b16 %v2623_v14 }
 0x5fe   :  { %3187 = vmatpush.bf16.msra.mxu3 %v4274_v32 }
 0x5ff   :  { %v2835_v34 = vpack.c.b16 %v2833_v11, %v2832_v24 }
 0x601   :  { %3988 = vmatmul.msk.bf16.gmra.mxu1 %vm2678_vm1, %v2835_v34  ;;  %v4273_v34 = vld [vmem:[%s5545_s7 + $0x100] sm:$0xff] }
 0x602   :  { %v2558_v16 = vpop.f32.mrf.mxu0  ;;  %3188 = vmatpush.bf16.msra.mxu3 %v4273_v34 }
 0x603   :  { %v2624_v31 = vpack.c.bf16 %v2558_v16, %v2558_v16 }
 0x605   :  { %3915 = vmatmul.msk.bf16.gmra.mxu0 %vm1456_vm0, %v4239_v30  ;;  %v2893_v5 = vunpack.c.l.b16 %v2624_v31 }
 0x60a   :  { %v2560_v26 = vpop.f32.mrf.mxu0 }
 0x60b   :  { %v2625_v2 = vpack.c.bf16 %v2560_v26, %v2560_v26 }
 0x60d   :  { %v2894_v59 = vunpack.c.l.b16 %v2625_v2 }
 0x60f   :  { %v2897_v6 = vpack.c.b16 %v2894_v59, %v2893_v5 }
 0x611   :  { %4005 = vmatmul.msk.bf16.vlgmr.msrb.gmra.mxu2 %vm2678_vm1, %v2897_v6 }
 0x612   :  { %v2563_v29 = vpop.f32.mrf.mxu0 }
 0x613   :  { %v2626_v36 = vpack.c.bf16 %v2563_v29, %v2563_v29 }
 0x615   :  { %3916 = vmatmul.msk.bf16.gmra.mxu0 %vm1456_vm0, %v4240_v38  ;;  %v2895_v44 = vunpack.c.l.b16 %v2626_v36 }
 0x61a   :  { %v2565_v43 = vpop.f32.mrf.mxu0 }
 0x61b   :  { %v2627_v19 = vpack.c.bf16 %v2565_v43, %v2565_v43 }
 0x61d   :  { %v2896_v56 = vunpack.c.l.b16 %v2627_v19 }
 0x61f   :  { %v2898_v42 = vpack.c.b16 %v2896_v56, %v2895_v44 }
 0x621   :  { %4006 = vmatmul.msk.bf16.gmra.mxu2 %vm2678_vm1, %v2898_v42 }
 0x622   :  { %v2568_v50 = vpop.f32.mrf.mxu0 }
 0x623   :  { %v2628_v17 = vpack.c.bf16 %v2568_v50, %v2568_v50 }
 0x625   :  { %v2956_v47 = vunpack.c.l.b16 %v2628_v17 }
 0x62a   :  { %v2570_v33 = vpop.f32.mrf.mxu0 }
 0x62b   :  { %v2629_v40 = vpack.c.bf16 %v2570_v33, %v2570_v33  ;;  %v2753_v33 = vpop.f32.mrf.mxu2 }
 0x62d   :  { %v2957_v10 = vunpack.c.l.b16 %v2629_v40 }
 0x62e   :  { %v2694_v17 = vpop.f32.mrf.mxu1 }
 0x62f   :  { %v2960_v13 = vpack.c.b16 %v2957_v10, %v2956_v47 }
 0x631   :  { %4023 = vmatmul.msk.bf16.vlgmr.msrb.gmra.mxu3 %vm2678_vm1, %v2960_v13 }
 0x632   :  { %v2573_v37 = vpop.f32.mrf.mxu0 }
 0x633   :  { %v2630_v60 = vpack.c.bf16 %v2573_v37, %v2573_v37  ;;  %v2755_v53 = vpop.f32.mrf.mxu2 }
 0x635   :  { %v2958_v48 = vunpack.c.l.b16 %v2630_v60 }
 0x636   :  { %v2696_v40 = vpop.f32.mrf.mxu1 }
 0x63a   :  { %v2575_v58 = vpop.f32.mrf.mxu0 }
 0x63b   :  { %v2631_v62 = vpack.c.bf16 %v2575_v58, %v2575_v58  ;;  %v2758_v13 = vpop.f32.mrf.mxu2 }
 0x63d   :  { %v2959_v4 = vunpack.c.l.b16 %v2631_v62 }
 0x63e   :  { %v2699_v10 = vpop.f32.mrf.mxu1 }
 0x63f   :  { %v2961_v8 = vpack.c.b16 %v2959_v4, %v2958_v48 }
 0x641   :  { %4024 = vmatmul.msk.bf16.gmra.mxu3 %vm2678_vm1, %v2961_v8 }
 0x642   :  { %v2578_v0 = vpop.f32.mrf.mxu0 }
 0x643   :  { %v2632_v45 = vpack.c.bf16 %v2578_v0, %v2578_v0  ;;  %v2760_v58 = vpop.f32.mrf.mxu2 }
 0x645   :  { %v3019_v3 = vunpack.c.l.b16 %v2632_v45 }
 0x646   :  { %v2701_v60 = vpop.f32.mrf.mxu1 }
 0x64a   :  { %v2580_v35 = vpop.f32.mrf.mxu0 }
 0x64b   :  { %v2633_v7 = vpack.c.bf16 %v2580_v35, %v2580_v35 }
 0x64d   :  { %v3020_v12 = vunpack.c.l.b16 %v2633_v7 }
 0x64f   :  { %v3023_v18 = vpack.c.b16 %v3020_v12, %v3019_v3  ;;  %v2754_v12 = vadd.f32 %v2753_v33, %v2694_v17 }
 0x651   :  { %4041 = vmatmul.msk.bf16.vlgmr.msra.gmra.mxu1 %vm2678_vm1, %v3023_v18 }
 0x652   :  { %v2583_v20 = vpop.f32.mrf.mxu0 }
 0x653   :  { %v2634_v61 = vpack.c.bf16 %v2583_v20, %v2583_v20 }
 0x654   :  { %v2812_v47 = vpop.f32.mrf.mxu3 }
 0x655   :  { %v3021_v22 = vunpack.c.l.b16 %v2634_v61  ;;  %v2822_v20 = vadd.f32 %v2812_v47, %v2754_v12 }
 0x65a   :  { %v2585_v63 = vpop.f32.mrf.mxu0 }
 0x65b   :  { %v2635_v9 = vpack.c.bf16 %v2585_v63, %v2585_v63 }
 0x65c   :  { %v2814_v37 = vpop.f32.mrf.mxu3 }
 0x65d   :  { %v3022_v23 = vunpack.c.l.b16 %v2635_v9 }
 0x65f   :  { %v3024_v21 = vpack.c.b16 %v3022_v23, %v3021_v22  ;;  %v2756_v23 = vadd.f32 %v2755_v53, %v2696_v40 }
 0x661   :  { %4042 = vmatmul.msk.bf16.gmra.mxu1 %vm2678_vm1, %v3024_v21  ;;  %v2823_v25 = vadd.f32 %v2814_v37, %v2756_v23 }
 0x662   :  { %v2588_v52 = vpop.f32.mrf.mxu0 }
 0x663   :  { %v2636_v14 = vpack.c.bf16 %v2588_v52, %v2588_v52 }
 0x664   :  { %v2817_v62 = vpop.f32.mrf.mxu3 }
 0x665   :  { %v3082_v41 = vunpack.c.l.b16 %v2636_v14 }
 0x66a   :  { %v2590_v24 = vpop.f32.mrf.mxu0 }
 0x66b   :  { %v2637_v11 = vpack.c.bf16 %v2590_v24, %v2590_v24  ;;  %v4303_v24 = vld [vmem:[%s5548_s8] ss:$0 sm:$0xff] }
 0x66c   :  { %v2819_v8 = vpop.f32.mrf.mxu3 }
 0x66d   :  { %v3083_v30 = vunpack.c.l.b16 %v2637_v11 }
 0x66e   :  { %v2875_v48 = vpop.f32.mrf.mxu1 }
 0x66f   :  { %v3086_v16 = vpack.c.b16 %v3083_v30, %v3082_v41  ;;  %v2885_v63 = vadd.f32 %v2875_v48, %v2822_v20 }
 0x671   :  { %4059 = vmatmul.msk.bf16.vlgmr.msra.gmra.mxu2 %vm2678_vm1, %v3086_v16  ;;  %v2759_v16 = vadd.f32 %v2758_v13, %v2699_v10 }
 0x672   :  { %v2593_v39 = vpop.f32.mrf.mxu0 }
 0x673   :  { %v2638_v28 = vpack.c.bf16 %v2593_v39, %v2593_v39 }
 0x675   :  { %v3084_v2 = vunpack.c.l.b16 %v2638_v28 }
 0x676   :  { %v2877_v1 = vpop.f32.mrf.mxu1 }
 0x677   :  { %v2886_v32 = vadd.f32 %v2877_v1, %v2823_v25 }
 0x67a   :  { %v2595_v31 = vpop.f32.mrf.mxu0 }
 0x67b   :  { %v2639_v26 = vpack.c.bf16 %v2595_v31, %v2595_v31  ;;  %v2824_v31 = vadd.f32 %v2817_v62, %v2759_v16 }
 0x67d   :  { %v3085_v55 = vunpack.c.l.b16 %v2639_v26 }
 0x67e   :  { %v2880_v46 = vpop.f32.mrf.mxu1 }
 0x67f   :  { %v3087_v5 = vpack.c.b16 %v3085_v55, %v3084_v2  ;;  %v2887_v2 = vadd.f32 %v2880_v46, %v2824_v31 }
 0x681   :  { %4060 = vmatmul.msk.bf16.gmra.mxu2 %vm2678_vm1, %v3087_v5 }
 0x682   :  { %v2598_v59 = vpop.f32.mrf.mxu0 }
 0x683   :  { %v2640_v6 = vpack.c.bf16 %v2598_v59, %v2598_v59 }
 0x685   :  { %v3145_v36 = vunpack.c.l.b16 %v2640_v6 }
 0x686   :  { %v2882_v7 = vpop.f32.mrf.mxu1 }
 0x68a   :  { %v2600_v38 = vpop.f32.mrf.mxu0 }
 0x68b   :  { %v2641_v29 = vpack.c.bf16 %v2600_v38, %v2600_v38 }
 0x68d   :  { %v3146_v43 = vunpack.c.l.b16 %v2641_v29 }
 0x68f   :  { %v3149_v19 = vpack.c.b16 %v3146_v43, %v3145_v36  ;;  %v2761_v36 = vadd.f32 %v2760_v58, %v2701_v60 }
 0x691   :  { %4077 = vmatmul.msk.bf16.vlgmr.msra.gmra.mxu3 %vm2678_vm1, %v3149_v19 }
 0x692   :  { %v2603_v44 = vpop.f32.mrf.mxu0 }
 0x693   :  { %v2642_v56 = vpack.c.bf16 %v2603_v44, %v2603_v44  ;;  %v2825_v44 = vadd.f32 %v2819_v8, %v2761_v36 }
 0x694   :  { %v2938_v4 = vpop.f32.mrf.mxu2 }
 0x695   :  { %v3147_v50 = vunpack.c.l.b16 %v2642_v56  ;;  %v2948_v22 = vadd.f32 %v2938_v4, %v2885_v63 }
 0x69a   :  { %v2605_v42 = vpop.f32.mrf.mxu0 }
 0x69b   :  { %v2643_v49 = vpack.c.bf16 %v2605_v42, %v2605_v42  ;;  %v2888_v42 = vadd.f32 %v2882_v7, %v2825_v44 }
 0x69c   :  { %v2940_v0 = vpop.f32.mrf.mxu2 }
 0x69d   :  { %v3148_v54 = vunpack.c.l.b16 %v2643_v49  ;;  %v2949_v41 = vadd.f32 %v2940_v0, %v2886_v32 }
 0x69f   :  { %v3150_v51 = vpack.c.b16 %v3148_v54, %v3147_v50 }
 0x6a1   :  { %4078 = vmatmul.msk.bf16.gmra.mxu3 %vm2678_vm1, %v3150_v51 }
 0x6a4   :  { %v2943_v45 = vpop.f32.mrf.mxu2 }
 0x6a5   :  { %v2950_v6 = vadd.f32 %v2943_v45, %v2887_v2 }
 0x6ac   :  { %v2945_v15 = vpop.f32.mrf.mxu2 }
 0x6ad   :  { %v2951_v54 = vadd.f32 %v2945_v15, %v2888_v42 }
 0x6b4   :  { %v3001_v57 = vpop.f32.mrf.mxu3 }
 0x6b5   :  { %v3011_v21 = vadd.f32 %v3001_v57, %v2948_v22 }
 0x6bc   :  { %v3003_v35 = vpop.f32.mrf.mxu3 }
 0x6bd   :  { %v3012_v39 = vadd.f32 %v3003_v35, %v2949_v41 }
 0x6c4   :  { %v3006_v3 = vpop.f32.mrf.mxu3 }
 0x6c5   :  { %v3013_v43 = vadd.f32 %v3006_v3, %v2950_v6 }
 0x6cc   :  { %v3008_v9 = vpop.f32.mrf.mxu3 }
 0x6cd   :  { %v3014_v33 = vadd.f32 %v3008_v9, %v2951_v54 }
 0x6ce   :  { %v3064_v18 = vpop.f32.mrf.mxu1 }
 0x6cf   :  { %v3074_v52 = vadd.f32 %v3064_v18, %v3011_v21 }
 0x6d6   :  { %v3066_v27 = vpop.f32.mrf.mxu1 }
 0x6d7   :  { %v3075_v26 = vadd.f32 %v3066_v27, %v3012_v39 }
 0x6de   :  { %v3069_v5 = vpop.f32.mrf.mxu1 }
 0x6df   :  { %v3076_v56 = vadd.f32 %v3069_v5, %v3013_v43 }
 0x6e6   :  { %v3071_v17 = vpop.f32.mrf.mxu1 }
 0x6e7   :  { %v3077_v47 = vadd.f32 %v3071_v17, %v3014_v33 }
 0x6f4   :  { %v3127_v61 = vpop.f32.mrf.mxu2 }
 0x6f5   :  { %v3137_v14 = vadd.f32 %v3127_v61, %v3074_v52 }
 0x6fc   :  { %v3129_v11 = vpop.f32.mrf.mxu2 }
 0x6fd   :  { %v3138_v55 = vadd.f32 %v3129_v11, %v3075_v26 }
 0x704   :  { %v3132_v29 = vpop.f32.mrf.mxu2 }
 0x705   :  { %v3139_v49 = vadd.f32 %v3132_v29, %v3076_v56 }
 0x70c   :  { %v3134_v53 = vpop.f32.mrf.mxu2 }
 0x70d   :  { %v3140_v10 = vadd.f32 %v3134_v53, %v3077_v47 }
 0x714   :  { %v3190_v34 = vpop.f32.mrf.mxu3 }
 0x715   :  { %v3200_v30 = vadd.f32 %v3190_v34, %v3137_v14 }
 0x717   :  { %v3207_v28 = vadd.f32 %v4303_v24, %v3200_v30 }
 0x719   :  { %3211 = vst.msk [vmem:[%s5549_s9] sm:$0xff] %vm2678_vm1, %v3207_v28 }
 0x71c   :  { %v3192_v59 = vpop.f32.mrf.mxu3 }
 0x71d   :  { %v3201_v38 = vadd.f32 %v3192_v59, %v3138_v55 }
 0x71f   :  { %v3208_v19 = vadd.f32 %v4303_v24, %v3201_v38 }
 0x721   :  { %3212 = vst.msk [vmem:[%s5549_s9 + $0x8] sm:$0xff] %vm2678_vm1, %v3208_v19 }
 0x724   :  { %v3195_v50 = vpop.f32.mrf.mxu3 }
 0x725   :  { %v3202_v51 = vadd.f32 %v3195_v50, %v3139_v49 }
 0x727   :  { %v3209_v40 = vadd.f32 %v4303_v24, %v3202_v51 }
 0x729   :  { %3213 = vst.msk [vmem:[%s5549_s9 + $0x10] sm:$0xff] %vm2678_vm1, %v3209_v40 }
 0x72c   :  { %v3197_v13 = vpop.f32.mrf.mxu3 }
 0x72d   :  { %v3203_v37 = vadd.f32 %v3197_v13, %v3140_v10 }
 0x72f   :  { %v3210_v60 = vadd.f32 %v4303_v24, %v3203_v37 }
 0x731   :  { %3214 = vst.msk [vmem:[%s5549_s9 + $0x18] sm:$0xff] %vm2678_vm1, %v3210_v60 }

</bundles_post_ra>
